<compile_context>
chip_gen: v7x
topology: tpu7x:2x2x1
jax: 0.10.0
libtpu: 0.0.40
codegen_flags: <defaults>
</compile_context>

<pallas_src>
import functools
import jax
import jax.numpy as jnp
from jax.experimental import pallas as pl
from jax.experimental.pallas import tpu as pltpu

LANE = 128


def _round_up(n, m):
    return ((n + m - 1) // m) * m


# -----------------------------------------------------------------------------
# Pallas kernel: whole-network forward on one (TILE_M, C) row slab.
# -----------------------------------------------------------------------------
def _motion_enc_kernel(T, x_ref,
                       w0, b0, w1, b1, w2, b2, w3, b3, w4, b4,
                       wlin, blin, w1bd, b1bd, w2bd, b2bd,
                       out_ref):
    x = x_ref[...].astype(jnp.float32)                     # (M, Cin)
    M = x.shape[0]
    dot_dtype = w0.dtype                                   # f32 or bf16 weights

    # Per-sample boundary masks, built ONCE and reused by every conv layer.
    # Row r belongs to sample r // T, time step r % T.
    row = jax.lax.broadcasted_iota(jnp.int32, (M, 1), 0)
    keep_prev = (row % T != 0).astype(jnp.float32)         # zero pad at t == 0
    keep_next = (row % T != T - 1).astype(jnp.float32)     # zero pad at t == T-1

    def conv_relu(h, w_ref, b_ref):
        # Conv1d(k=3, pad=1) as ONE matmul: [prev | cur | next] @ (3*Cin, Cout)
        h_prev = keep_prev * jnp.roll(h, 1, axis=0)
        h_next = keep_next * jnp.roll(h, -1, axis=0)
        hcat = jnp.concatenate([h_prev, h, h_next], axis=-1).astype(dot_dtype)
        y = jnp.dot(hcat, w_ref[...],
                    preferred_element_type=jnp.float32) + b_ref[...]
        return jnp.maximum(y, 0.0)                         # ReLU (dropout = id)

    h = conv_relu(x, w0, b0)                               # (M, 256)
    h = conv_relu(h, w1, b1)                               # (M, 256)
    h = conv_relu(h, w2, b2)                               # (M, 128)
    h = conv_relu(h, w3, b3)                               # (M, 128)
    h = conv_relu(h, w4, b4)                               # (M, 64)

    # share_linear ++ spec_linear fused along N: 64 -> 64
    ss = jnp.dot(h.astype(dot_dtype), wlin[...],
                 preferred_element_type=jnp.float32) + blin[...]
    # share_mean ++ spec_mean as block-diagonal MLP: 64 -> 64 -> N_pad(>=2P)
    h1 = jnp.maximum(
        jnp.dot(ss.astype(dot_dtype), w1bd[...],
                preferred_element_type=jnp.float32) + b1bd[...], 0.0)
    z = jnp.dot(h1.astype(dot_dtype), w2bd[...],
                preferred_element_type=jnp.float32) + b2bd[...]
    out_ref[...] = z.astype(out_ref.dtype)                 # (M, N_pad) lane-dense


# -----------------------------------------------------------------------------
# Host-side parameter fusion (conv reshape, tail concat / block-diagonal,
# lane-padding of the final projection so the kernel store is unmasked).
# -----------------------------------------------------------------------------
def fuse_params(params, pose_hidden, weight_dtype):
    (w0, b0, w1, b1, w2, b2, w3, b3, w4, b4,
     shw, shb, spw, spb,
     shm_w1, shm_b1, shm_w2, shm_b2,
     spm_w1, spm_b1, spm_w2, spm_b2) = params

    def wcast(w):
        return w.astype(weight_dtype)

    fused = []
    for w, b in ((w0, b0), (w1, b1), (w2, b2), (w3, b3), (w4, b4)):
        k, cin, cout = w.shape                             # (3, Cin, Cout)
        fused += [wcast(w.reshape(k * cin, cout)), b.astype(jnp.float32)]

    # share/spec linear fused along N (64 -> 64)
    fused += [wcast(jnp.concatenate([shw, spw], axis=1)),
              jnp.concatenate([shb, spb], axis=1).astype(jnp.float32)]

    def block_diag(a, b):
        ra, ca = a.shape
        rb, cb = b.shape
        out = jnp.zeros((ra + rb, ca + cb), jnp.float32)
        return out.at[:ra, :ca].set(a).at[ra:, ca:].set(b)

    # mean MLPs fused block-diagonally: 64 -> 64 -> 2*P
    fused += [wcast(block_diag(shm_w1, spm_w1)),
              jnp.concatenate([shm_b1, spm_b1], axis=1).astype(jnp.float32)]

    w2bd = block_diag(shm_w2, spm_w2)                      # (64, 2*P)
    b2bd = jnp.concatenate([shm_b2, spm_b2], axis=1)       # (1, 2*P)
    # Zero-pad the output projection to a full 128-lane slab -> unmasked stores.
    n_out = 2 * pose_hidden
    n_pad = _round_up(n_out, LANE)
    if n_pad != n_out:
        w2bd = jnp.pad(w2bd, ((0, 0), (0, n_pad - n_out)))
        b2bd = jnp.pad(b2bd, ((0, 0), (0, n_pad - n_out)))
    fused += [wcast(w2bd), b2bd.astype(jnp.float32)]
    return fused, n_pad


# -----------------------------------------------------------------------------
# Wrapper: fold B into M, tile rows, call the kernel, split the output.
# -----------------------------------------------------------------------------
def motion_enc_forward(x, params, pose_hidden, *, weight_dtype=jnp.float32):
    """x: (B, T, C) float32.  Returns (z_share, z_spec), each (B, T, pose_hidden)."""
    B, T, C = x.shape
    fused, n_pad = fuse_params(params, pose_hidden, weight_dtype)

    # Whole samples per row tile; ~256 rows per grid step, grid=(1,) when small.
    samples_per_tile = min(B, max(1, 256 // T))
    tile_m = samples_per_tile * T
    num_tiles = pl.cdiv(B, samples_per_tile)
    if num_tiles > 1 and tile_m % 8 != 0:
        # keep the block sublane-aligned; fall back to a single tile
        samples_per_tile, tile_m, num_tiles = B, B * T, 1

    B_pad = num_tiles * samples_per_tile
    x2 = x.reshape(B * T, C).astype(jnp.float32)
    if B_pad != B:
        x2 = jnp.pad(x2, ((0, (B_pad - B) * T), (0, 0)))
    M_pad = B_pad * T

    kernel = functools.partial(_motion_enc_kernel, T)
    in_specs = [pl.BlockSpec((tile_m, C), lambda i: (i, 0))]
    in_specs += [pl.BlockSpec(p.shape, lambda i: (0, 0)) for p in fused]
    out_specs = pl.BlockSpec((tile_m, n_pad), lambda i: (i, 0))

    out = pl.pallas_call(
        kernel,
        out_shape=jax.ShapeDtypeStruct((M_pad, n_pad), jnp.float32),
        grid_spec=pltpu.PrefetchScalarGridSpec(
            num_scalar_prefetch=0,
            grid=(num_tiles,),
            in_specs=in_specs,
            out_specs=out_specs,
        ),
        compiler_params=pltpu.CompilerParams(
            dimension_semantics=("parallel",)),
    )(x2, *fused)

    z = out[:B * T, :2 * pose_hidden].reshape(B, T, 2 * pose_hidden)
    return z[..., :pose_hidden], z[..., pose_hidden:]


# -----------------------------------------------------------------------------
# Deterministic parameter construction + pure-JAX f32 reference.
# -----------------------------------------------------------------------------
def make_params(key, in_ch, pose_hidden):
    tcn_channels = [256, 256, 128, 128, 64]
    keys = iter(jax.random.split(key, 64))
    params = []

    def lin(ki, cin, cout):
        w = 0.05 * jax.random.normal(ki, (cin, cout), jnp.float32)
        b = 0.05 * jax.random.normal(next(keys), (1, cout), jnp.float32)
        return w, b

    # 5 conv layers: weight stored as (3, Cin, Cout), bias as (1, Cout)
    cin = in_ch
    for cout in tcn_channels:
        w = 0.05 * jax.random.normal(next(keys), (3, cin, cout), jnp.float32)
        b = 0.05 * jax.random.normal(next(keys), (1, cout), jnp.float32)
        params += [w, b]
        cin = cout

    # share_linear / spec_linear : 64 -> 32
    params += list(lin(next(keys), 64, 32))
    params += list(lin(next(keys), 64, 32))
    # share_mean : 32 -> 32 -> pose_hidden ; spec_mean : same
    params += list(lin(next(keys), 32, 32))
    params += list(lin(next(keys), 32, pose_hidden))
    params += list(lin(next(keys), 32, 32))
    params += list(lin(next(keys), 32, pose_hidden))
    return params


def reference_forward(x, params):
    (w0, b0, w1, b1, w2, b2, w3, b3, w4, b4,
     shw, shb, spw, spb,
     shm_w1, shm_b1, shm_w2, shm_b2,
     spm_w1, spm_b1, spm_w2, spm_b2) = params

    def conv(h, w, b):
        hp = jnp.pad(h, ((0, 0), (1, 1), (0, 0)))
        y = hp[:, :-2] @ w[0] + hp[:, 1:-1] @ w[1] + hp[:, 2:] @ w[2] + b
        return jax.nn.relu(y)

    h = x
    for w, b in ((w0, b0), (w1, b1), (w2, b2), (w3, b3), (w4, b4)):
        h = conv(h, w, b)
    share = h @ shw + shb
    spec = h @ spw + spb
    zs = jax.nn.relu(share @ shm_w1 + shm_b1) @ shm_w2 + shm_b2
    zp = jax.nn.relu(spec @ spm_w1 + spm_b1) @ spm_w2 + spm_b2
    return zs, zp


if __name__ == "__main__":
    # args: input_joint_num=2, input_joint_repr_dim=2 -> C=4; pose_hidden_size=32
    B, T, C = 2, 8, 4
    pose_hidden = 32

    key = jax.random.PRNGKey(0)
    kx, kp = jax.random.split(key)
    x = jax.random.normal(kx, (B, T, C), jnp.float32)
    params = make_params(kp, C, pose_hidden)

    ref_share, ref_spec = reference_forward(x, params)

    # f32 path (tight numeric check).
    z_share, z_spec = motion_enc_forward(x, params, pose_hidden,
                                         weight_dtype=jnp.float32)
    jax.block_until_ready((z_share, z_spec))
    assert z_share.shape == (B, T, pose_hidden) and z_spec.shape == (B, T, pose_hidden)
    assert jnp.allclose(z_share, ref_share, atol=1e-4, rtol=1e-4)
    assert jnp.allclose(z_spec, ref_spec, atol=1e-4, rtol=1e-4)

    # bf16-weight path (v6e/v7x MXU-native; f32 accumulation; looser check).
    z_share16, z_spec16 = motion_enc_forward(x, params, pose_hidden,
                                             weight_dtype=jnp.bfloat16)
    jax.block_until_ready((z_share16, z_spec16))
    assert jnp.allclose(z_share16, ref_share, atol=3e-2, rtol=3e-2)
    assert jnp.allclose(z_spec16, ref_spec, atol=3e-2, rtol=3e-2)

    print("KERNEL_OK")
</pallas_src>

<mosaic_0001>
module attributes {stable_mosaic.version = 11 : i64} {
  func.func @_motion_enc_kernel(%arg0: i32, %arg1: memref<16x4xf32, #tpu.memory_space<vmem>>, %arg2: memref<12x256xf32, #tpu.memory_space<vmem>>, %arg3: memref<1x256xf32, #tpu.memory_space<vmem>>, %arg4: memref<768x256xf32, #tpu.memory_space<vmem>>, %arg5: memref<1x256xf32, #tpu.memory_space<vmem>>, %arg6: memref<768x128xf32, #tpu.memory_space<vmem>>, %arg7: memref<1x128xf32, #tpu.memory_space<vmem>>, %arg8: memref<384x128xf32, #tpu.memory_space<vmem>>, %arg9: memref<1x128xf32, #tpu.memory_space<vmem>>, %arg10: memref<384x64xf32, #tpu.memory_space<vmem>>, %arg11: memref<1x64xf32, #tpu.memory_space<vmem>>, %arg12: memref<64x64xf32, #tpu.memory_space<vmem>>, %arg13: memref<1x64xf32, #tpu.memory_space<vmem>>, %arg14: memref<64x64xf32, #tpu.memory_space<vmem>>, %arg15: memref<1x64xf32, #tpu.memory_space<vmem>>, %arg16: memref<64x128xf32, #tpu.memory_space<vmem>>, %arg17: memref<1x128xf32, #tpu.memory_space<vmem>>, %arg18: memref<16x128xf32, #tpu.memory_space<vmem>>) attributes {dimension_semantics = [#tpu.dimension_semantics<parallel>], iteration_bounds = array<i64: 1>, scalar_prefetch = 0 : i64, scratch_operands = 0 : i64, tpu.core_type = #tpu.core_type<tc>, window_params = [{transform_indices = @transform_0, window_bounds = array<i64: 16, 4>}, {pipeline_mode = #tpu.pipeline_mode<synchronous>, transform_indices = @transform_1, window_bounds = array<i64: 12, 256>}, {pipeline_mode = #tpu.pipeline_mode<synchronous>, transform_indices = @transform_2, window_bounds = array<i64: 1, 256>}, {pipeline_mode = #tpu.pipeline_mode<synchronous>, transform_indices = @transform_3, window_bounds = array<i64: 768, 256>}, {pipeline_mode = #tpu.pipeline_mode<synchronous>, transform_indices = @transform_4, window_bounds = array<i64: 1, 256>}, {pipeline_mode = #tpu.pipeline_mode<synchronous>, transform_indices = @transform_5, window_bounds = array<i64: 768, 128>}, {pipeline_mode = #tpu.pipeline_mode<synchronous>, transform_indices = @transform_6, window_bounds = array<i64: 1, 128>}, {pipeline_mode = #tpu.pipeline_mode<synchronous>, transform_indices = @transform_7, window_bounds = array<i64: 384, 128>}, {pipeline_mode = #tpu.pipeline_mode<synchronous>, transform_indices = @transform_8, window_bounds = array<i64: 1, 128>}, {pipeline_mode = #tpu.pipeline_mode<synchronous>, transform_indices = @transform_9, window_bounds = array<i64: 384, 64>}, {pipeline_mode = #tpu.pipeline_mode<synchronous>, transform_indices = @transform_10, window_bounds = array<i64: 1, 64>}, {pipeline_mode = #tpu.pipeline_mode<synchronous>, transform_indices = @transform_11, window_bounds = array<i64: 64, 64>}, {pipeline_mode = #tpu.pipeline_mode<synchronous>, transform_indices = @transform_12, window_bounds = array<i64: 1, 64>}, {pipeline_mode = #tpu.pipeline_mode<synchronous>, transform_indices = @transform_13, window_bounds = array<i64: 64, 64>}, {pipeline_mode = #tpu.pipeline_mode<synchronous>, transform_indices = @transform_14, window_bounds = array<i64: 1, 64>}, {pipeline_mode = #tpu.pipeline_mode<synchronous>, transform_indices = @transform_15, window_bounds = array<i64: 64, 128>}, {pipeline_mode = #tpu.pipeline_mode<synchronous>, transform_indices = @transform_16, window_bounds = array<i64: 1, 128>}, {transform_indices = @transform_17, window_bounds = array<i64: 16, 128>}]} {
    %c0 = arith.constant 0 : index
    %c0_0 = arith.constant 0 : index
    %0 = vector.load %arg1[%c0, %c0_0] : memref<16x4xf32, #tpu.memory_space<vmem>>, vector<16x4xf32>
    %1 = tpu.iota {dimensions = array<i32: 0>} : vector<16x1xi32>
    %c8_i32 = arith.constant 8 : i32
    %c0_i32 = arith.constant 0 : i32
    %2 = arith.cmpi eq, %c8_i32, %c0_i32 : i32
    %c1_i32 = arith.constant 1 : i32
    %3 = arith.select %2, %c1_i32, %c8_i32 : i32
    %4 = vector.broadcast %3 : i32 to vector<16x1xi32>
    %5 = arith.remsi %1, %4 : vector<16x1xi32>
    %c0_i32_1 = arith.constant 0 : i32
    %6 = vector.broadcast %c0_i32_1 : i32 to vector<16x1xi32>
    %7 = arith.cmpi ne, %5, %6 : vector<16x1xi32>
    %c0_i32_2 = arith.constant 0 : i32
    %8 = vector.broadcast %c0_i32_2 : i32 to vector<16x1xi32>
    %9 = arith.cmpi slt, %5, %8 : vector<16x1xi32>
    %c0_i32_3 = arith.constant 0 : i32
    %10 = arith.cmpi slt, %3, %c0_i32_3 : i32
    %11 = vector.broadcast %10 : i1 to vector<16x1xi1>
    %12 = vector.broadcast %11 : vector<16x1xi1> to vector<16x1xi1>
    %13 = arith.xori %9, %12 : vector<16x1xi1>
    %14 = arith.andi %13, %7 : vector<16x1xi1>
    %15 = vector.broadcast %3 : i32 to vector<16x1xi32>
    %16 = arith.addi %5, %15 : vector<16x1xi32>
    %17 = arith.select %14, %16, %5 : vector<16x1xi1>, vector<16x1xi32>
    %c0_i32_4 = arith.constant 0 : i32
    %18 = vector.broadcast %c0_i32_4 : i32 to vector<16x1xi32>
    %19 = arith.cmpi ne, %17, %18 : vector<16x1xi32>
    %20 = arith.extui %19 : vector<16x1xi1> to vector<16x1xi32>
    %21 = arith.sitofp %20 : vector<16x1xi32> to vector<16x1xf32>
    %c8_i32_5 = arith.constant 8 : i32
    %c0_i32_6 = arith.constant 0 : i32
    %22 = arith.cmpi eq, %c8_i32_5, %c0_i32_6 : i32
    %c1_i32_7 = arith.constant 1 : i32
    %23 = arith.select %22, %c1_i32_7, %c8_i32_5 : i32
    %24 = vector.broadcast %23 : i32 to vector<16x1xi32>
    %25 = arith.remsi %1, %24 : vector<16x1xi32>
    %c0_i32_8 = arith.constant 0 : i32
    %26 = vector.broadcast %c0_i32_8 : i32 to vector<16x1xi32>
    %27 = arith.cmpi ne, %25, %26 : vector<16x1xi32>
    %c0_i32_9 = arith.constant 0 : i32
    %28 = vector.broadcast %c0_i32_9 : i32 to vector<16x1xi32>
    %29 = arith.cmpi slt, %25, %28 : vector<16x1xi32>
    %c0_i32_10 = arith.constant 0 : i32
    %30 = arith.cmpi slt, %23, %c0_i32_10 : i32
    %31 = vector.broadcast %30 : i1 to vector<16x1xi1>
    %32 = vector.broadcast %31 : vector<16x1xi1> to vector<16x1xi1>
    %33 = arith.xori %29, %32 : vector<16x1xi1>
    %34 = arith.andi %33, %27 : vector<16x1xi1>
    %35 = vector.broadcast %23 : i32 to vector<16x1xi32>
    %36 = arith.addi %25, %35 : vector<16x1xi32>
    %37 = arith.select %34, %36, %25 : vector<16x1xi1>, vector<16x1xi32>
    %c7_i32 = arith.constant 7 : i32
    %38 = vector.broadcast %c7_i32 : i32 to vector<16x1xi32>
    %39 = arith.cmpi ne, %37, %38 : vector<16x1xi32>
    %40 = arith.extui %39 : vector<16x1xi1> to vector<16x1xi32>
    %41 = arith.sitofp %40 : vector<16x1xi32> to vector<16x1xf32>
    %42 = vector.extract_strided_slice %0 {offsets = [15, 0], sizes = [1, 4], strides = [1, 1]} : vector<16x4xf32> to vector<1x4xf32>
    %43 = vector.extract_strided_slice %0 {offsets = [0, 0], sizes = [15, 4], strides = [1, 1]} : vector<16x4xf32> to vector<15x4xf32>
    %44 = tpu.concatenate %42, %43 in 0 : vector<1x4xf32>, vector<15x4xf32> -> vector<16x4xf32>
    %45 = vector.broadcast %21 : vector<16x1xf32> to vector<16x4xf32>
    %46 = arith.mulf %45, %44 : vector<16x4xf32>
    %47 = vector.extract_strided_slice %0 {offsets = [1, 0], sizes = [15, 4], strides = [1, 1]} : vector<16x4xf32> to vector<15x4xf32>
    %48 = vector.extract_strided_slice %0 {offsets = [0, 0], sizes = [1, 4], strides = [1, 1]} : vector<16x4xf32> to vector<1x4xf32>
    %49 = tpu.concatenate %47, %48 in 0 : vector<15x4xf32>, vector<1x4xf32> -> vector<16x4xf32>
    %50 = vector.broadcast %41 : vector<16x1xf32> to vector<16x4xf32>
    %51 = arith.mulf %50, %49 : vector<16x4xf32>
    %52 = tpu.concatenate %46, %0, %51 in 1 : vector<16x4xf32>, vector<16x4xf32>, vector<16x4xf32> -> vector<16x12xf32>
    %c0_11 = arith.constant 0 : index
    %c0_12 = arith.constant 0 : index
    %53 = vector.load %arg2[%c0_11, %c0_12] : memref<12x256xf32, #tpu.memory_space<vmem>>, vector<12x256xf32>
    %cst = arith.constant dense<0.000000e+00> : vector<16x256xf32>
    %54 = tpu.matmul %52, %53, %cst {dimension_numbers = #tpu.dot_dimension_numbers<[1], [0], [0], [1], [0, 0, 1, 1], [], []>} : vector<16x12xf32>, vector<12x256xf32>, vector<16x256xf32> -> vector<16x256xf32>
    %c0_13 = arith.constant 0 : index
    %c0_14 = arith.constant 0 : index
    %55 = vector.load %arg3[%c0_13, %c0_14] : memref<1x256xf32, #tpu.memory_space<vmem>>, vector<1x256xf32>
    %56 = vector.broadcast %55 : vector<1x256xf32> to vector<16x256xf32>
    %57 = arith.addf %54, %56 : vector<16x256xf32>
    %cst_15 = arith.constant 0.000000e+00 : f32
    %58 = vector.broadcast %cst_15 : f32 to vector<16x256xf32>
    %59 = arith.maximumf %57, %58 : vector<16x256xf32>
    %60 = vector.extract_strided_slice %59 {offsets = [15, 0], sizes = [1, 256], strides = [1, 1]} : vector<16x256xf32> to vector<1x256xf32>
    %61 = vector.extract_strided_slice %59 {offsets = [0, 0], sizes = [15, 256], strides = [1, 1]} : vector<16x256xf32> to vector<15x256xf32>
    %62 = tpu.concatenate %60, %61 in 0 : vector<1x256xf32>, vector<15x256xf32> -> vector<16x256xf32>
    %63 = vector.broadcast %21 : vector<16x1xf32> to vector<16x256xf32>
    %64 = arith.mulf %63, %62 : vector<16x256xf32>
    %65 = vector.extract_strided_slice %59 {offsets = [1, 0], sizes = [15, 256], strides = [1, 1]} : vector<16x256xf32> to vector<15x256xf32>
    %66 = vector.extract_strided_slice %59 {offsets = [0, 0], sizes = [1, 256], strides = [1, 1]} : vector<16x256xf32> to vector<1x256xf32>
    %67 = tpu.concatenate %65, %66 in 0 : vector<15x256xf32>, vector<1x256xf32> -> vector<16x256xf32>
    %68 = vector.broadcast %41 : vector<16x1xf32> to vector<16x256xf32>
    %69 = arith.mulf %68, %67 : vector<16x256xf32>
    %70 = tpu.concatenate %64, %59, %69 in 1 : vector<16x256xf32>, vector<16x256xf32>, vector<16x256xf32> -> vector<16x768xf32>
    %c0_16 = arith.constant 0 : index
    %c0_17 = arith.constant 0 : index
    %71 = vector.load %arg4[%c0_16, %c0_17] : memref<768x256xf32, #tpu.memory_space<vmem>>, vector<768x256xf32>
    %cst_18 = arith.constant dense<0.000000e+00> : vector<16x256xf32>
    %72 = tpu.matmul %70, %71, %cst_18 {dimension_numbers = #tpu.dot_dimension_numbers<[1], [0], [0], [1], [0, 0, 1, 1], [], []>} : vector<16x768xf32>, vector<768x256xf32>, vector<16x256xf32> -> vector<16x256xf32>
    %c0_19 = arith.constant 0 : index
    %c0_20 = arith.constant 0 : index
    %73 = vector.load %arg5[%c0_19, %c0_20] : memref<1x256xf32, #tpu.memory_space<vmem>>, vector<1x256xf32>
    %74 = vector.broadcast %73 : vector<1x256xf32> to vector<16x256xf32>
    %75 = arith.addf %72, %74 : vector<16x256xf32>
    %cst_21 = arith.constant 0.000000e+00 : f32
    %76 = vector.broadcast %cst_21 : f32 to vector<16x256xf32>
    %77 = arith.maximumf %75, %76 : vector<16x256xf32>
    %78 = vector.extract_strided_slice %77 {offsets = [15, 0], sizes = [1, 256], strides = [1, 1]} : vector<16x256xf32> to vector<1x256xf32>
    %79 = vector.extract_strided_slice %77 {offsets = [0, 0], sizes = [15, 256], strides = [1, 1]} : vector<16x256xf32> to vector<15x256xf32>
    %80 = tpu.concatenate %78, %79 in 0 : vector<1x256xf32>, vector<15x256xf32> -> vector<16x256xf32>
    %81 = vector.broadcast %21 : vector<16x1xf32> to vector<16x256xf32>
    %82 = arith.mulf %81, %80 : vector<16x256xf32>
    %83 = vector.extract_strided_slice %77 {offsets = [1, 0], sizes = [15, 256], strides = [1, 1]} : vector<16x256xf32> to vector<15x256xf32>
    %84 = vector.extract_strided_slice %77 {offsets = [0, 0], sizes = [1, 256], strides = [1, 1]} : vector<16x256xf32> to vector<1x256xf32>
    %85 = tpu.concatenate %83, %84 in 0 : vector<15x256xf32>, vector<1x256xf32> -> vector<16x256xf32>
    %86 = vector.broadcast %41 : vector<16x1xf32> to vector<16x256xf32>
    %87 = arith.mulf %86, %85 : vector<16x256xf32>
    %88 = tpu.concatenate %82, %77, %87 in 1 : vector<16x256xf32>, vector<16x256xf32>, vector<16x256xf32> -> vector<16x768xf32>
    %c0_22 = arith.constant 0 : index
    %c0_23 = arith.constant 0 : index
    %89 = vector.load %arg6[%c0_22, %c0_23] : memref<768x128xf32, #tpu.memory_space<vmem>>, vector<768x128xf32>
    %cst_24 = arith.constant dense<0.000000e+00> : vector<16x128xf32>
    %90 = tpu.matmul %88, %89, %cst_24 {dimension_numbers = #tpu.dot_dimension_numbers<[1], [0], [0], [1], [0, 0, 1, 1], [], []>} : vector<16x768xf32>, vector<768x128xf32>, vector<16x128xf32> -> vector<16x128xf32>
    %c0_25 = arith.constant 0 : index
    %c0_26 = arith.constant 0 : index
    %91 = vector.load %arg7[%c0_25, %c0_26] : memref<1x128xf32, #tpu.memory_space<vmem>>, vector<1x128xf32>
    %92 = vector.broadcast %91 : vector<1x128xf32> to vector<16x128xf32>
    %93 = arith.addf %90, %92 : vector<16x128xf32>
    %cst_27 = arith.constant 0.000000e+00 : f32
    %94 = vector.broadcast %cst_27 : f32 to vector<16x128xf32>
    %95 = arith.maximumf %93, %94 : vector<16x128xf32>
    %96 = vector.extract_strided_slice %95 {offsets = [15, 0], sizes = [1, 128], strides = [1, 1]} : vector<16x128xf32> to vector<1x128xf32>
    %97 = vector.extract_strided_slice %95 {offsets = [0, 0], sizes = [15, 128], strides = [1, 1]} : vector<16x128xf32> to vector<15x128xf32>
    %98 = tpu.concatenate %96, %97 in 0 : vector<1x128xf32>, vector<15x128xf32> -> vector<16x128xf32>
    %99 = vector.broadcast %21 : vector<16x1xf32> to vector<16x128xf32>
    %100 = arith.mulf %99, %98 : vector<16x128xf32>
    %101 = vector.extract_strided_slice %95 {offsets = [1, 0], sizes = [15, 128], strides = [1, 1]} : vector<16x128xf32> to vector<15x128xf32>
    %102 = vector.extract_strided_slice %95 {offsets = [0, 0], sizes = [1, 128], strides = [1, 1]} : vector<16x128xf32> to vector<1x128xf32>
    %103 = tpu.concatenate %101, %102 in 0 : vector<15x128xf32>, vector<1x128xf32> -> vector<16x128xf32>
    %104 = vector.broadcast %41 : vector<16x1xf32> to vector<16x128xf32>
    %105 = arith.mulf %104, %103 : vector<16x128xf32>
    %106 = tpu.concatenate %100, %95, %105 in 1 : vector<16x128xf32>, vector<16x128xf32>, vector<16x128xf32> -> vector<16x384xf32>
    %c0_28 = arith.constant 0 : index
    %c0_29 = arith.constant 0 : index
    %107 = vector.load %arg8[%c0_28, %c0_29] : memref<384x128xf32, #tpu.memory_space<vmem>>, vector<384x128xf32>
    %cst_30 = arith.constant dense<0.000000e+00> : vector<16x128xf32>
    %108 = tpu.matmul %106, %107, %cst_30 {dimension_numbers = #tpu.dot_dimension_numbers<[1], [0], [0], [1], [0, 0, 1, 1], [], []>} : vector<16x384xf32>, vector<384x128xf32>, vector<16x128xf32> -> vector<16x128xf32>
    %c0_31 = arith.constant 0 : index
    %c0_32 = arith.constant 0 : index
    %109 = vector.load %arg9[%c0_31, %c0_32] : memref<1x128xf32, #tpu.memory_space<vmem>>, vector<1x128xf32>
    %110 = vector.broadcast %109 : vector<1x128xf32> to vector<16x128xf32>
    %111 = arith.addf %108, %110 : vector<16x128xf32>
    %cst_33 = arith.constant 0.000000e+00 : f32
    %112 = vector.broadcast %cst_33 : f32 to vector<16x128xf32>
    %113 = arith.maximumf %111, %112 : vector<16x128xf32>
    %114 = vector.extract_strided_slice %113 {offsets = [15, 0], sizes = [1, 128], strides = [1, 1]} : vector<16x128xf32> to vector<1x128xf32>
    %115 = vector.extract_strided_slice %113 {offsets = [0, 0], sizes = [15, 128], strides = [1, 1]} : vector<16x128xf32> to vector<15x128xf32>
    %116 = tpu.concatenate %114, %115 in 0 : vector<1x128xf32>, vector<15x128xf32> -> vector<16x128xf32>
    %117 = vector.broadcast %21 : vector<16x1xf32> to vector<16x128xf32>
    %118 = arith.mulf %117, %116 : vector<16x128xf32>
    %119 = vector.extract_strided_slice %113 {offsets = [1, 0], sizes = [15, 128], strides = [1, 1]} : vector<16x128xf32> to vector<15x128xf32>
    %120 = vector.extract_strided_slice %113 {offsets = [0, 0], sizes = [1, 128], strides = [1, 1]} : vector<16x128xf32> to vector<1x128xf32>
    %121 = tpu.concatenate %119, %120 in 0 : vector<15x128xf32>, vector<1x128xf32> -> vector<16x128xf32>
    %122 = vector.broadcast %41 : vector<16x1xf32> to vector<16x128xf32>
    %123 = arith.mulf %122, %121 : vector<16x128xf32>
    %124 = tpu.concatenate %118, %113, %123 in 1 : vector<16x128xf32>, vector<16x128xf32>, vector<16x128xf32> -> vector<16x384xf32>
    %c0_34 = arith.constant 0 : index
    %c0_35 = arith.constant 0 : index
    %125 = vector.load %arg10[%c0_34, %c0_35] : memref<384x64xf32, #tpu.memory_space<vmem>>, vector<384x64xf32>
    %cst_36 = arith.constant dense<0.000000e+00> : vector<16x64xf32>
    %126 = tpu.matmul %124, %125, %cst_36 {dimension_numbers = #tpu.dot_dimension_numbers<[1], [0], [0], [1], [0, 0, 1, 1], [], []>} : vector<16x384xf32>, vector<384x64xf32>, vector<16x64xf32> -> vector<16x64xf32>
    %c0_37 = arith.constant 0 : index
    %c0_38 = arith.constant 0 : index
    %127 = vector.load %arg11[%c0_37, %c0_38] : memref<1x64xf32, #tpu.memory_space<vmem>>, vector<1x64xf32>
    %128 = vector.broadcast %127 : vector<1x64xf32> to vector<16x64xf32>
    %129 = arith.addf %126, %128 : vector<16x64xf32>
    %cst_39 = arith.constant 0.000000e+00 : f32
    %130 = vector.broadcast %cst_39 : f32 to vector<16x64xf32>
    %131 = arith.maximumf %129, %130 : vector<16x64xf32>
    %c0_40 = arith.constant 0 : index
    %c0_41 = arith.constant 0 : index
    %132 = vector.load %arg12[%c0_40, %c0_41] : memref<64x64xf32, #tpu.memory_space<vmem>>, vector<64x64xf32>
    %cst_42 = arith.constant dense<0.000000e+00> : vector<16x64xf32>
    %133 = tpu.matmul %131, %132, %cst_42 {dimension_numbers = #tpu.dot_dimension_numbers<[1], [0], [0], [1], [0, 0, 1, 1], [], []>} : vector<16x64xf32>, vector<64x64xf32>, vector<16x64xf32> -> vector<16x64xf32>
    %c0_43 = arith.constant 0 : index
    %c0_44 = arith.constant 0 : index
    %134 = vector.load %arg13[%c0_43, %c0_44] : memref<1x64xf32, #tpu.memory_space<vmem>>, vector<1x64xf32>
    %135 = vector.broadcast %134 : vector<1x64xf32> to vector<16x64xf32>
    %136 = arith.addf %133, %135 : vector<16x64xf32>
    %c0_45 = arith.constant 0 : index
    %c0_46 = arith.constant 0 : index
    %137 = vector.load %arg14[%c0_45, %c0_46] : memref<64x64xf32, #tpu.memory_space<vmem>>, vector<64x64xf32>
    %cst_47 = arith.constant dense<0.000000e+00> : vector<16x64xf32>
    %138 = tpu.matmul %136, %137, %cst_47 {dimension_numbers = #tpu.dot_dimension_numbers<[1], [0], [0], [1], [0, 0, 1, 1], [], []>} : vector<16x64xf32>, vector<64x64xf32>, vector<16x64xf32> -> vector<16x64xf32>
    %c0_48 = arith.constant 0 : index
    %c0_49 = arith.constant 0 : index
    %139 = vector.load %arg15[%c0_48, %c0_49] : memref<1x64xf32, #tpu.memory_space<vmem>>, vector<1x64xf32>
    %140 = vector.broadcast %139 : vector<1x64xf32> to vector<16x64xf32>
    %141 = arith.addf %138, %140 : vector<16x64xf32>
    %cst_50 = arith.constant 0.000000e+00 : f32
    %142 = vector.broadcast %cst_50 : f32 to vector<16x64xf32>
    %143 = arith.maximumf %141, %142 : vector<16x64xf32>
    %c0_51 = arith.constant 0 : index
    %c0_52 = arith.constant 0 : index
    %144 = vector.load %arg16[%c0_51, %c0_52] : memref<64x128xf32, #tpu.memory_space<vmem>>, vector<64x128xf32>
    %cst_53 = arith.constant dense<0.000000e+00> : vector<16x128xf32>
    %145 = tpu.matmul %143, %144, %cst_53 {dimension_numbers = #tpu.dot_dimension_numbers<[1], [0], [0], [1], [0, 0, 1, 1], [], []>} : vector<16x64xf32>, vector<64x128xf32>, vector<16x128xf32> -> vector<16x128xf32>
    %c0_54 = arith.constant 0 : index
    %c0_55 = arith.constant 0 : index
    %146 = vector.load %arg17[%c0_54, %c0_55] : memref<1x128xf32, #tpu.memory_space<vmem>>, vector<1x128xf32>
    %147 = vector.broadcast %146 : vector<1x128xf32> to vector<16x128xf32>
    %148 = arith.addf %145, %147 : vector<16x128xf32>
    %c0_56 = arith.constant 0 : index
    %c0_57 = arith.constant 0 : index
    %149 = vector.load %arg18[%c0_56, %c0_57] : memref<16x128xf32, #tpu.memory_space<vmem>>, vector<16x128xf32>
    tpu.vector_store %arg18[%c0_56, %c0_57], %148 {strides = array<i32>} : memref<16x128xf32, #tpu.memory_space<vmem>>, vector<16x128xf32>,
    return
  }
  func.func @transform_0(%arg0: i32) -> (i32, i32) {
    %c0_i32 = arith.constant 0 : i32
    %c0_i32_0 = arith.constant 0 : i32
    return %arg0, %c0_i32 : i32, i32
  }
  func.func @transform_1(%arg0: i32) -> (i32, i32) {
    %c0_i32 = arith.constant 0 : i32
    %c0_i32_0 = arith.constant 0 : i32
    %c0_i32_1 = arith.constant 0 : i32
    return %c0_i32, %c0_i32_0 : i32, i32
  }
  func.func @transform_2(%arg0: i32) -> (i32, i32) {
    %c0_i32 = arith.constant 0 : i32
    %c0_i32_0 = arith.constant 0 : i32
    %c0_i32_1 = arith.constant 0 : i32
    return %c0_i32, %c0_i32_0 : i32, i32
  }
  func.func @transform_3(%arg0: i32) -> (i32, i32) {
    %c0_i32 = arith.constant 0 : i32
    %c0_i32_0 = arith.constant 0 : i32
    %c0_i32_1 = arith.constant 0 : i32
    return %c0_i32, %c0_i32_0 : i32, i32
  }
  func.func @transform_4(%arg0: i32) -> (i32, i32) {
    %c0_i32 = arith.constant 0 : i32
    %c0_i32_0 = arith.constant 0 : i32
    %c0_i32_1 = arith.constant 0 : i32
    return %c0_i32, %c0_i32_0 : i32, i32
  }
  func.func @transform_5(%arg0: i32) -> (i32, i32) {
    %c0_i32 = arith.constant 0 : i32
    %c0_i32_0 = arith.constant 0 : i32
    %c0_i32_1 = arith.constant 0 : i32
    return %c0_i32, %c0_i32_0 : i32, i32
  }
  func.func @transform_6(%arg0: i32) -> (i32, i32) {
    %c0_i32 = arith.constant 0 : i32
    %c0_i32_0 = arith.constant 0 : i32
    %c0_i32_1 = arith.constant 0 : i32
    return %c0_i32, %c0_i32_0 : i32, i32
  }
  func.func @transform_7(%arg0: i32) -> (i32, i32) {
    %c0_i32 = arith.constant 0 : i32
    %c0_i32_0 = arith.constant 0 : i32
    %c0_i32_1 = arith.constant 0 : i32
    return %c0_i32, %c0_i32_0 : i32, i32
  }
  func.func @transform_8(%arg0: i32) -> (i32, i32) {
    %c0_i32 = arith.constant 0 : i32
    %c0_i32_0 = arith.constant 0 : i32
    %c0_i32_1 = arith.constant 0 : i32
    return %c0_i32, %c0_i32_0 : i32, i32
  }
  func.func @transform_9(%arg0: i32) -> (i32, i32) {
    %c0_i32 = arith.constant 0 : i32
    %c0_i32_0 = arith.constant 0 : i32
    %c0_i32_1 = arith.constant 0 : i32
    return %c0_i32, %c0_i32_0 : i32, i32
  }
  func.func @transform_10(%arg0: i32) -> (i32, i32) {
    %c0_i32 = arith.constant 0 : i32
    %c0_i32_0 = arith.constant 0 : i32
    %c0_i32_1 = arith.constant 0 : i32
    return %c0_i32, %c0_i32_0 : i32, i32
  }
  func.func @transform_11(%arg0: i32) -> (i32, i32) {
    %c0_i32 = arith.constant 0 : i32
    %c0_i32_0 = arith.constant 0 : i32
    %c0_i32_1 = arith.constant 0 : i32
    return %c0_i32, %c0_i32_0 : i32, i32
  }
  func.func @transform_12(%arg0: i32) -> (i32, i32) {
    %c0_i32 = arith.constant 0 : i32
    %c0_i32_0 = arith.constant 0 : i32
    %c0_i32_1 = arith.constant 0 : i32
    return %c0_i32, %c0_i32_0 : i32, i32
  }
  func.func @transform_13(%arg0: i32) -> (i32, i32) {
    %c0_i32 = arith.constant 0 : i32
    %c0_i32_0 = arith.constant 0 : i32
    %c0_i32_1 = arith.constant 0 : i32
    return %c0_i32, %c0_i32_0 : i32, i32
  }
  func.func @transform_14(%arg0: i32) -> (i32, i32) {
    %c0_i32 = arith.constant 0 : i32
    %c0_i32_0 = arith.constant 0 : i32
    %c0_i32_1 = arith.constant 0 : i32
    return %c0_i32, %c0_i32_0 : i32, i32
  }
  func.func @transform_15(%arg0: i32) -> (i32, i32) {
    %c0_i32 = arith.constant 0 : i32
    %c0_i32_0 = arith.constant 0 : i32
    %c0_i32_1 = arith.constant 0 : i32
    return %c0_i32, %c0_i32_0 : i32, i32
  }
  func.func @transform_16(%arg0: i32) -> (i32, i32) {
    %c0_i32 = arith.constant 0 : i32
    %c0_i32_0 = arith.constant 0 : i32
    %c0_i32_1 = arith.constant 0 : i32
    return %c0_i32, %c0_i32_0 : i32, i32
  }
  func.func @transform_17(%arg0: i32) -> (i32, i32) {
    %c0_i32 = arith.constant 0 : i32
    %c0_i32_0 = arith.constant 0 : i32
    return %arg0, %c0_i32 : i32, i32
  }
}

</mosaic_0001>

<bundles_post_ra>
// kernel: tpu_custom_call.1
= control target key start
LH: loop header
LB: loop body
LE: loop exit
PB: predicated region body
PF: predicated region fallthrough
CT: control target
= control target key end

     0   :  { %s3577_s0 = inlined_call_operand.vmem [shape: f32[16,4], index: 0, kind: input, shape index: {}]   ;;  %s3578_s1 = inlined_call_operand.vmem [shape: f32[12,256], index: 1, kind: input, shape index: {}]   ;;  %s3579_s2 = inlined_call_operand.vmem [shape: f32[1,256], index: 2, kind: input, shape index: {}]   ;;  %s3580_s3 = inlined_call_operand.hbm [shape: f32[768,256], index: 3, kind: input, shape index: {}]   ;;  %s3581_s4 = inlined_call_operand.vmem [shape: f32[1,256], index: 4, kind: input, shape index: {}]   ;;  %s3582_s5 = inlined_call_operand.hbm [shape: f32[768,128], index: 5, kind: input, shape index: {}]   ;;  %s3583_s6 = inlined_call_operand.vmem [shape: f32[1,128], index: 6, kind: input, shape index: {}]   ;;  %s3584_s7 = inlined_call_operand.vmem [shape: f32[384,128], index: 7, kind: input, shape index: {}]   ;;  %s3585_s8 = inlined_call_operand.vmem [shape: f32[1,128], index: 8, kind: input, shape index: {}]   ;;  %s3586_s9 = inlined_call_operand.vmem [shape: f32[384,64], index: 9, kind: input, shape index: {}]   ;;  %s3587_s10 = inlined_call_operand.vmem [shape: f32[1,64], index: 10, kind: input, shape index: {}]   ;;  %s3588_s11 = inlined_call_operand.vmem [shape: f32[64,64], index: 11, kind: input, shape index: {}]   ;;  %s3589_s12 = inlined_call_operand.vmem [shape: f32[1,64], index: 12, kind: input, shape index: {}]   ;;  %s3590_s13 = inlined_call_operand.vmem [shape: f32[64,64], index: 13, kind: input, shape index: {}]   ;;  %s3591_s14 = inlined_call_operand.vmem [shape: f32[1,64], index: 14, kind: input, shape index: {}]   ;;  %s3592_s15 = inlined_call_operand.vmem [shape: f32[64,128], index: 15, kind: input, shape index: {}]   ;;  %s3593_s16 = inlined_call_operand.vmem [shape: f32[1,128], index: 16, kind: input, shape index: {}]   ;;  %s3594_s17 = inlined_call_operand.hbm [shape: f32[16,128], index: 17, kind: output, shape index: {}]  }
   0x1   :  { %3597 = sst [smem:[#allocation11_spill]] %s3577_s0 }
   0x2   :  { %3598 = sst [smem:[#allocation12_spill]] %s3578_s1 }
   0x3   :  { %22 = vsyncpa [#allocation3], 0 }
   0x4   :  { %23 = vsyncpa [#allocation6], 0 }
   0x5   :  { %24 = vsyncpa [#allocation4], 0  ;;  %s2860_s24 = smov [#allocation2]   ;;  %s2788_s28 = scalar_lea.hbm %s3580_s3, 24576 }
   0x6   :  { %s36_s25 = sshll.u32 %s2860_s24, 4  ;;  %p2789_p0 = scmp.ne.s32.totalorder %s3580_s3, %s2788_s28  ;;  %s37_s25 = int_to_ptr.vmem [resolvable:$true] %s36_s25 }
   0x7   :  { %p2792_p1 = scmp.lt.u32.totalorder %s2788_s28, %s3580_s3 }
   0x9   :  { %p2794_p2 = pnand %p2792_p1, %p2789_p0 }
   0xb   :  { %2797 = shalt.err (!%p2794_p2)
}
   0xc   :  { %s2798_s19 = scalar_lea.vmem %s37_s25, 24576  ;;  %p2803_p4 = scmp.lt.s32.totalorder %s37_s25, %s37_s25 }
   0xd   :  { %p2799_p3 = scmp.ne.s32.totalorder %s37_s25, %s2798_s19  ;;  %p2804_p5 = scmp.lt.s32.totalorder %s2798_s19, %s2798_s19 }
   0xf   :  { %p2805_p6 = por %p2804_p5, %p2803_p4 }
  0x11   :  { %p2806_p7 = pnand %p2805_p6, %p2799_p3 }
  0x13   :  { %2809 = shalt.err (!%p2806_p7)
}
  0x14   :  { %s2861_s1 = smov 256   ;;  %s2862_s20 = smov 16  }
  0x15   :  { %42 = dma.hbm_to_vmem [thread:$0]  %s3580_s3, 24576, %s37_s25, [#allocation3], %s2861_s1, %s2861_s1, %s2862_s20  }
  0x16   :  { %s2863_s23 = smov [#allocation5]   ;;  %s2810_s28 = scalar_lea.hbm %s3582_s5, 12288 }
  0x17   :  { %s50_s24 = sshll.u32 %s2863_s23, 4  ;;  %p2811_p8 = scmp.ne.s32.totalorder %s3582_s5, %s2810_s28  ;;  %s51_s24 = int_to_ptr.vmem [resolvable:$true] %s50_s24 }
  0x18   :  { %p2814_p9 = scmp.lt.u32.totalorder %s2810_s28, %s3582_s5 }
  0x1a   :  { %p2816_p10 = pnand %p2814_p9, %p2811_p8 }
  0x1c   :  { %2819 = shalt.err (!%p2816_p10)
}
  0x1d   :  { %s2820_s19 = scalar_lea.vmem %s51_s24, 12288  ;;  %p2825_p12 = scmp.lt.s32.totalorder %s51_s24, %s51_s24 }
  0x1e   :  { %p2821_p11 = scmp.ne.s32.totalorder %s51_s24, %s2820_s19  ;;  %p2826_p13 = scmp.lt.s32.totalorder %s2820_s19, %s2820_s19 }
  0x20   :  { %p2827_p0 = por %p2826_p13, %p2825_p12 }
  0x22   :  { %p2828_p1 = pnand %p2827_p0, %p2821_p11 }
  0x24   :  { %2831 = shalt.err (!%p2828_p1)
}
  0x25   :  { %s2864_s3 = smov 128   ;;  %s2865_s25 = smov 8  }
  0x26   :  { %56 = dma.hbm_to_vmem [thread:$0]  %s3582_s5, 12288, %s51_s24, [#allocation6], %s2864_s3, %s2864_s3, %s2865_s25  }
  0x27   :  { %2854 = dma.done.wait [#allocation3], 24576  }
  0x28   :  { %2855 = vsyncadd [#allocation3], 4294942720 }
  0x29   :  { %2856 = dma.done.wait [#allocation6], 12288  }
  0x2a   :  { %2857 = vsyncadd [#allocation6], 4294955008  ;;  %v87_v0 = vlaneseq  ;;  %v2866_v1 = vmov 0.0   ;;  %vm191_vm0 = vcmask 1043456   ;;  %s3599_s22 = sld [smem:[#allocation11_spill]]  ;;  %vm138_vm2 = vcmask 1046528  }
  0x2b   :  { %262 = vmatprep.mubr.f32.mxu0 %v2866_v1  ;;  %vm130_vm3 = vcmask 1040384   ;;  %s3600_s28 = sld [smem:[#allocation12_spill]]  ;;  %s2867_s29 = smov 4   ;;  %vm2868_vm4 = vmmov 1   ;;  %v320_v19 = vld [vmem:[#allocation2 + $0x8] sm:$0xff]  ;;  %v322_v24 = vld [vmem:[#allocation2 + $0x18] sm:$0xff] }
  0x2c   :  { %v2988_v2 = vshrl.u32 %v87_v0, 7  ;;  %vm3013_vm5 = vmpackc.low %vm191_vm0, %vm2868_vm4  ;;  %v319_v25 = vld [vmem:[#allocation2] sm:$0xff]  ;;  %v321_v26 = vld [vmem:[#allocation2 + $0x10] sm:$0xff]  ;;  %v2302_v33 = vpack.c.bf16 %v322_v24, %v320_v19  ;;  %vm162_vm9 = vcmask 31744   ;;  %vm165_vm10 = vcmask 64512  }
  0x2d   :  { %v324_v29 = vld [vmem:[#allocation2 + $0x28] sm:$0xff]  ;;  %v326_v30 = vld [vmem:[#allocation2 + $0x38] sm:$0xff]  ;;  %v2304_v34 = vpack.c.bf16 %v321_v26, %v319_v25  ;;  %v323_v35 = vld [vmem:[#allocation2 + $0x20] sm:$0xff]  ;;  %vm184_vm11 = vcmask 97280   ;;  %vm1597_vm12 = vcmask 523264  }
  0x2e   :  { %v94_v3 = vand.u32 7, %v2988_v2  ;;  %v2992_v4 = vadd.s32 8, %v2988_v2  ;;  %v325_v36 = vld [vmem:[#allocation2 + $0x30] sm:$0xff]  ;;  %v2306_v37 = vpack.c.bf16 %v326_v30, %v324_v29  ;;  %v328_v38 = vld [vmem:[#allocation2 + $0x48] sm:$0xff]  ;;  %v330_v39 = vld [vmem:[#allocation2 + $0x58] sm:$0xff]  ;;  %2303 = vmatprep.subr.bf16.mxu1 %v2302_v33 }
  0x2f   :  { %2305 = vmatpush1.bf16.msra.mxu1 %v2304_v34  ;;  %v2308_v40 = vpack.c.bf16 %v325_v36, %v323_v35  ;;  %v2310_v41 = vpack.c.bf16 %v330_v39, %v328_v38  ;;  %v327_v42 = vld [vmem:[#allocation2 + $0x40] sm:$0xff]  ;;  %v329_v43 = vld [vmem:[#allocation2 + $0x50] sm:$0xff]  ;;  %v332_v44 = vld [vmem:[#allocation2 + $0x68] sm:$0xff] }
  0x30   :  { %vm120_vm1 = vcmp.ne.s32.totalorder %v94_v3, 7  ;;  %v101_v5 = vand.u32 7, %v2992_v4  ;;  %v85_v6 = vld [vmem:[%s3599_s22] sm:$0xff]  ;;  %v86_v7 = vld [vmem:[%s3599_s22 + $0x8] sm:$0xff]  ;;  %2307 = vmatprep.subr.bf16.mxu1 %v2306_v37  ;;  %v2312_v46 = vpack.c.bf16 %v329_v43, %v327_v42  ;;  %v331_v48 = vld [vmem:[#allocation2 + $0x60] sm:$0xff]  ;;  %vm114_vm7 = vcmp.ne.s32.totalorder %v94_v3, 0 }
  0x31   :  { %v3004_v8 = vsel %vm120_vm1, 1.0, %v2866_v1  ;;  %v169_v9 = vld [vmem:[%s3600_s28 + $0x8] sm:$0xff]  ;;  %148 = vrot.lane.b32.xlu0 %v85_v6, %s2867_s29  ;;  %v131_v10 = vrot.slane %v85_v6, 7  ;;  %v139_v11 = vrot.slane %v85_v6, 1  ;;  %150 = vrot.lane.b32.xlu1 %v86_v7, %s2867_s29  ;;  %v127_v12 = vrot.slane %v86_v7, 7  ;;  %v168_v17 = vld [vmem:[%s3600_s28] sm:$0xff] }
  0x32   :  { %v140_v13 = vrot.slane %v86_v7, 1  ;;  %v171_v14 = vld [vmem:[%s3600_s28 + $0x18] sm:$0xf]  ;;  %vm121_vm6 = vcmp.ne.s32.totalorder %v101_v5, 7  ;;  %v170_v18 = vld [vmem:[%s3600_s28 + $0x10] sm:$0xf] }
  0x33   :  { %v2296_v16 = vpack.c.bf16 %v171_v14, %v169_v9  ;;  %v3027_v21 = vsel %vm121_vm6, 1.0, %v2866_v1  ;;  %v3031_v23 = vsel %vm130_vm3, %v127_v12, %v131_v10  ;;  %v3038_v31 = vsel %vm130_vm3, %v131_v10, %v127_v12  ;;  %v334_v45 = vld [vmem:[#allocation2 + $0x78] sm:$0xff]  ;;  %2309 = vmatpush1.bf16.msra.mxu1 %v2308_v40  ;;  %v333_v49 = vld [vmem:[#allocation2 + $0x70] sm:$0xff]  ;;  %v336_v50 = vld [vmem:[#allocation2 + $0x88] sm:$0xff] }
  0x34   :  { %v141_v20 = vsel %vm138_vm2, %v139_v11, %v140_v13  ;;  %v145_v22 = vsel %vm138_vm2, %v140_v13, %v139_v11  ;;  %v2299_v32 = vpack.c.bf16 %v170_v18, %v168_v17  ;;  %2311 = vmatprep.subr.bf16.mxu1 %v2310_v41  ;;  %v2314_v47 = vpack.c.bf16 %v334_v45, %v332_v44  ;;  %v338_v51 = vld [vmem:[#allocation2 + $0x98] sm:$0xff]  ;;  %v335_v54 = vld [vmem:[#allocation2 + $0x80] sm:$0xff]  ;;  %v337_v55 = vld [vmem:[#allocation2 + $0x90] sm:$0xff] }
  0x35   :  { %v146_v27 = vmul.f32 %v3004_v8, %v141_v20  ;;  %v147_v28 = vmul.f32 %v3027_v21, %v145_v22  ;;  %2298 = vmatprep.subr.msk.bf16.mxu0 %vm3013_vm5, %v2296_v16  ;;  %v2316_v52 = vpack.c.bf16 %v333_v49, %v331_v48  ;;  %v2318_v53 = vpack.c.bf16 %v338_v51, %v336_v50  ;;  %v340_v56 = vld [vmem:[#allocation2 + $0xa8] sm:$0xff]  ;;  %v342_v57 = vld [vmem:[#allocation2 + $0xb8] sm:$0xff]  ;;  %v339_v60 = vld [vmem:[#allocation2 + $0xa0] sm:$0xff] }
  0x36   :  { %2301 = vmatpush1.bf16.msk.msra.mxu0 %vm3013_vm5, %v2299_v32  ;;  %v2320_v58 = vpack.c.bf16 %v337_v55, %v335_v54  ;;  %v2322_v59 = vpack.c.bf16 %v342_v57, %v340_v56  ;;  %v341_v61 = vld [vmem:[#allocation2 + $0xb0] sm:$0xff]  ;;  %v344_v62 = vld [vmem:[#allocation2 + $0xc8] sm:$0xff]  ;;  %v346_v63 = vld [vmem:[#allocation2 + $0xd8] sm:$0xff]  ;;  %vm115_vm8 = vcmp.ne.s32.totalorder %v101_v5, 0 }
  0x37   :  { %156 = vrot.lane.b32.xlu0 %v146_v27, %s2865_s25  ;;  %158 = vrot.lane.b32.xlu1 %v147_v28, %s2865_s25  ;;  %v2324_v0 = vpack.c.bf16 %v341_v61, %v339_v60  ;;  %v2326_v6 = vpack.c.bf16 %v346_v63, %v344_v62  ;;  %v343_v7 = vld [vmem:[#allocation2 + $0xc0] sm:$0xff]  ;;  %v345_v9 = vld [vmem:[#allocation2 + $0xd0] sm:$0xff]  ;;  %v348_v10 = vld [vmem:[#allocation2 + $0xe8] sm:$0xff]  ;;  %v3052_v49 = vsel %vm115_vm8, 1.0, %v2866_v1 }
  0x38   :  { %2313 = vmatpush1.bf16.msra.mxu1 %v2312_v46  ;;  %v350_v11 = vld [vmem:[#allocation2 + $0xf8] sm:$0xff]  ;;  %v2328_v12 = vpack.c.bf16 %v345_v9, %v343_v7  ;;  %v347_v14 = vld [vmem:[#allocation2 + $0xe0] sm:$0xff]  ;;  %v349_v15 = vld [vmem:[#allocation2 + $0xf0] sm:$0xff] }
  0x39   :  { %2315 = vmatprep.subr.bf16.mxu1 %v2314_v47  ;;  %v2330_v13 = vpack.c.bf16 %v350_v11, %v348_v10  ;;  %v352_v16 = vld [vmem:[#allocation2 + $0x108] sm:$0xff]  ;;  %v354_v17 = vld [vmem:[#allocation2 + $0x118] sm:$0xff]  ;;  %v2332_v18 = vpack.c.bf16 %v349_v15, %v347_v14  ;;  %v351_v20 = vld [vmem:[#allocation2 + $0x100] sm:$0xff]  ;;  %v3049_v47 = vsel %vm114_vm7, 1.0, %v2866_v1 }
  0x3a   :  { %v2334_v19 = vpack.c.bf16 %v354_v17, %v352_v16  ;;  %v353_v22 = vld [vmem:[#allocation2 + $0x110] sm:$0xff]  ;;  %v356_v24 = vld [vmem:[#allocation2 + $0x128] sm:$0xff]  ;;  %v358_v25 = vld [vmem:[#allocation2 + $0x138] sm:$0xff]  ;;  %v136_v50 = vmul.f32 %v3049_v47, %v3031_v23 }
  0x3b   :  { %v2336_v26 = vpack.c.bf16 %v353_v22, %v351_v20  ;;  %v2338_v27 = vpack.c.bf16 %v358_v25, %v356_v24  ;;  %v355_v28 = vld [vmem:[#allocation2 + $0x120] sm:$0xff]  ;;  %v357_v29 = vld [vmem:[#allocation2 + $0x130] sm:$0xff]  ;;  %v360_v30 = vld [vmem:[#allocation2 + $0x148] sm:$0xff]  ;;  %v180_v22 = vsub.s32 1, %v2988_v2 }
  0x3c   :  { %2317 = vmatpush1.bf16.msra.mxu1 %v2316_v52  ;;  %v362_v32 = vld [vmem:[#allocation2 + $0x158] sm:$0xff]  ;;  %v2340_v33 = vpack.c.bf16 %v357_v29, %v355_v28  ;;  %v359_v35 = vld [vmem:[#allocation2 + $0x140] sm:$0xff]  ;;  %v361_v36 = vld [vmem:[#allocation2 + $0x150] sm:$0xff]  ;;  %v137_v52 = vmul.f32 %v3052_v49, %v3038_v31 }
  0x3d   :  { %2319 = vmatprep.subr.bf16.mxu1 %v2318_v53  ;;  %v2342_v34 = vpack.c.bf16 %v362_v32, %v360_v30  ;;  %v364_v37 = vld [vmem:[#allocation2 + $0x168] sm:$0xff]  ;;  %v366_v38 = vld [vmem:[#allocation2 + $0x178] sm:$0xff]  ;;  %v2344_v39 = vpack.c.bf16 %v361_v36, %v359_v35  ;;  %v363_v41 = vld [vmem:[#allocation2 + $0x160] sm:$0xff] }
  0x3e   :  { %v2346_v40 = vpack.c.bf16 %v366_v38, %v364_v37  ;;  %v365_v42 = vld [vmem:[#allocation2 + $0x170] sm:$0xff]  ;;  %v368_v43 = vld [vmem:[#allocation2 + $0x188] sm:$0xff]  ;;  %v370_v44 = vld [vmem:[#allocation2 + $0x198] sm:$0xff] }
  0x3f   :  { %v2348_v45 = vpack.c.bf16 %v365_v42, %v363_v41  ;;  %v2350_v46 = vpack.c.bf16 %v370_v44, %v368_v43  ;;  %v367_v56 = vld [vmem:[#allocation2 + $0x180] sm:$0xff]  ;;  %v369_v57 = vld [vmem:[#allocation2 + $0x190] sm:$0xff]  ;;  %v376_v63 = vld [vmem:[#allocation2 + $0x1c8] sm:$0xff] }
  0x40   :  { %2321 = vmatpush1.bf16.msra.mxu1 %v2320_v58  ;;  %v2352_v23 = vpack.c.bf16 %v369_v57, %v367_v56  ;;  %v372_v58 = vld [vmem:[#allocation2 + $0x1a8] sm:$0xff]  ;;  %v371_v31 = vld [vmem:[#allocation2 + $0x1a0] sm:$0xff]  ;;  %v373_v61 = vld [vmem:[#allocation2 + $0x1b0] sm:$0xff] }
  0x41   :  { %2323 = vmatprep.subr.bf16.mxu1 %v2322_v59  ;;  %v374_v59 = vld [vmem:[#allocation2 + $0x1b8] sm:$0xff]  ;;  %v2356_v62 = vpack.c.bf16 %v373_v61, %v371_v31  ;;  %v375_v7 = vld [vmem:[#allocation2 + $0x1c0] sm:$0xff]  ;;  %v377_v9 = vld [vmem:[#allocation2 + $0x1d0] sm:$0xff] }
  0x42   :  { %v2354_v60 = vpack.c.bf16 %v374_v59, %v372_v58  ;;  %v380_v10 = vld [vmem:[#allocation2 + $0x1e8] sm:$0xff]  ;;  %v382_v11 = vld [vmem:[#allocation2 + $0x1f8] sm:$0xff]  ;;  %v381_v14 = vld [vmem:[#allocation2 + $0x1f0] sm:$0xff] }
  0x43   :  { %v384_v16 = vld [vmem:[#allocation2 + $0x208] sm:$0xff]  ;;  %v386_v17 = vld [vmem:[#allocation2 + $0x218] sm:$0xff]  ;;  %v172_v20 = vld [vmem:[%s3579_s2] sm:$0x3] }
  0x44   :  { %2325 = vmatpush1.bf16.msra.mxu1 %v2324_v0  ;;  %v378_v0 = vld [vmem:[#allocation2 + $0x1d8] sm:$0xff]  ;;  %v181_v25 = vrot.slane %v172_v20, %v180_v22  ;;  %v383_v43 = vld [vmem:[#allocation2 + $0x200] sm:$0xff]  ;;  %v385_v44 = vld [vmem:[#allocation2 + $0x210] sm:$0xff] }
  0x45   :  { %2327 = vmatprep.subr.bf16.mxu1 %v2326_v6  ;;  %v2358_v6 = vpack.c.bf16 %v378_v0, %v376_v63  ;;  %v392_v57 = vld [vmem:[#allocation2 + $0x248] sm:$0xff]  ;;  %v391_v31 = vld [vmem:[#allocation2 + $0x240] sm:$0xff]  ;;  %v393_v61 = vld [vmem:[#allocation2 + $0x250] sm:$0xff] }
  0x46   :  { %v398_v63 = vld [vmem:[#allocation2 + $0x278] sm:$0xff]  ;;  %v395_v0 = vld [vmem:[#allocation2 + $0x260] sm:$0xff] }
  0x48   :  { %2329 = vmatpush1.bf16.msra.mxu1 %v2328_v12  ;;  %v2362_v12 = vpack.c.bf16 %v382_v11, %v380_v10  ;;  %v2376_v10 = vpack.c.bf16 %v393_v61, %v391_v31  ;;  %v412_v31 = vld [vmem:[#allocation2 + $0x2e8] sm:$0xff]  ;;  %v414_v61 = vld [vmem:[#allocation2 + $0x2f8] sm:$0xff] }
  0x49   :  { %2331 = vmatprep.subr.bf16.mxu1 %v2330_v13  ;;  %v379_v13 = vld [vmem:[#allocation2 + $0x1e0] sm:$0xff] }
  0x4a   :  { %v2364_v15 = vpack.c.bf16 %v381_v14, %v379_v13  ;;  %v816_v13 = vld [vmem:[#allocation5 + $0x90] sm:$0xff]  ;;  %v817_v14 = vld [vmem:[#allocation5 + $0x98] sm:$0xff] }
  0x4c   :  { %2333 = vmatpush1.bf16.msra.mxu1 %v2332_v18  ;;  %v2366_v18 = vpack.c.bf16 %v386_v17, %v384_v16  ;;  %v2498_v17 = vpack.c.bf16 %v817_v14, %v816_v13  ;;  %v420_v13 = vld [vmem:[#allocation2 + $0x328] sm:$0xff]  ;;  %v422_v14 = vld [vmem:[#allocation2 + $0x338] sm:$0xff] }
  0x4d   :  { %2335 = vmatprep.subr.bf16.mxu1 %v2334_v19  ;;  %v176_v19 = vsub.s32 0, %v2988_v2 }
  0x4f   :  { %v177_v24 = vrot.slane %v172_v20, %v176_v19  ;;  %v801_v20 = vld [vmem:[#allocation5 + $0x18] sm:$0xff] }
  0x50   :  { %2337 = vmatpush1.bf16.msra.mxu1 %v2336_v26 }
  0x51   :  { %2339 = vmatprep.subr.bf16.mxu1 %v2338_v27 }
  0x54   :  { %2341 = vmatpush1.bf16.msra.mxu1 %v2340_v33 }
  0x55   :  { %2343 = vmatprep.subr.bf16.mxu1 %v2342_v34 }
  0x58   :  { %2345 = vmatpush1.bf16.msra.mxu1 %v2344_v39 }
  0x59   :  { %2347 = vmatprep.subr.bf16.mxu1 %v2346_v40 }
  0x5c   :  { %2349 = vmatpush1.bf16.msra.mxu1 %v2348_v45 }
  0x5d   :  { %2351 = vmatprep.subr.bf16.mxu1 %v2350_v46  ;;  %v388_v46 = vld [vmem:[#allocation2 + $0x228] sm:$0xff] }
  0x60   :  { %2353 = vmatpush1.bf16.msra.mxu1 %v2352_v23  ;;  %v394_v23 = vld [vmem:[#allocation2 + $0x258] sm:$0xff] }
  0x61   :  { %2355 = vmatprep.subr.bf16.mxu1 %v2354_v60  ;;  %v2374_v60 = vpack.c.bf16 %v394_v23, %v392_v57 }
  0x64   :  { %2357 = vmatpush1.bf16.msra.mxu1 %v2356_v62  ;;  %v396_v62 = vld [vmem:[#allocation2 + $0x268] sm:$0xff] }
  0x65   :  { %2359 = vmatprep.subr.bf16.mxu1 %v2358_v6  ;;  %v397_v6 = vld [vmem:[#allocation2 + $0x270] sm:$0xff] }
  0xa3   :  { %v149_v48 = vpop.permute.xlu0 %148  ;;  %v151_v51 = vpop.permute.xlu1 %150 }
  0xa4   :  { %v163_v3 = vsel %vm162_vm9, %v136_v50, %v149_v48  ;;  %v164_v53 = vsel %vm162_vm9, %v137_v52, %v151_v51  ;;  %v390_v48 = vld [vmem:[#allocation2 + $0x238] sm:$0xff] }
  0xa9   :  { %v157_v4 = vpop.permute.xlu0 %156  ;;  %v159_v54 = vpop.permute.xlu1 %158 }
  0xaa   :  { %v166_v5 = vsel %vm165_vm10, %v163_v3, %v157_v4  ;;  %v167_v55 = vsel %vm165_vm10, %v164_v53, %v159_v54  ;;  %v2368_v3 = vpack.c.bf16 %v385_v44, %v383_v43  ;;  %v387_v53 = vld [vmem:[#allocation2 + $0x220] sm:$0xff]  ;;  %v389_v54 = vld [vmem:[#allocation2 + $0x230] sm:$0xff]  ;;  %v404_v43 = vld [vmem:[#allocation2 + $0x2a8] sm:$0xff] }
  0xab   :  { %1899 = vmatmul.mubr.msk.f32.vlgmr.msra.gmra.mrb[0].mxu0 %vm184_vm11, %v166_v5  ;;  %v2370_v5 = vpack.c.bf16 %v390_v48, %v388_v46  ;;  %v2372_v58 = vpack.c.bf16 %v389_v54, %v387_v53  ;;  %v406_v44 = vld [vmem:[#allocation2 + $0x2b8] sm:$0xff]  ;;  %v403_v48 = vld [vmem:[#allocation2 + $0x2a0] sm:$0xff]  ;;  %v823_v53 = vld [vmem:[#allocation5 + $0xc8] sm:$0xff] }
  0xac   :  { %268 = vmatprep.mubr.f32.mxu0 %v2866_v1  ;;  %v2360_v1 = vpack.c.bf16 %v377_v9, %v375_v7  ;;  %v814_v7 = vld [vmem:[#allocation5 + $0x80] sm:$0xff]  ;;  %v815_v9 = vld [vmem:[#allocation5 + $0x88] sm:$0xff] }
  0xad   :  { %v2494_v11 = vpack.c.bf16 %v815_v9, %v814_v7  ;;  %v408_v54 = vld [vmem:[#allocation2 + $0x2c8] sm:$0xff]  ;;  %v418_v9 = vld [vmem:[#allocation2 + $0x318] sm:$0xff] }
  0xae   :  { %2361 = vmatpush1.bf16.msra.mxu1 %v2360_v1  ;;  %v798_v1 = vld [vmem:[#allocation5] sm:$0xff]  ;;  %v416_v7 = vld [vmem:[#allocation2 + $0x308] sm:$0xff] }
  0xaf   :  { %1900 = vmatmul.mubr.msk.f32.gmra.mrb[2].mxu0 %vm184_vm11, %v167_v55  ;;  %2363 = vmatprep.subr.bf16.mxu1 %v2362_v12  ;;  %v799_v12 = vld [vmem:[#allocation5 + $0x8] sm:$0xff] }
  0xb0   :  { %v2496_v16 = vpack.c.bf16 %v799_v12, %v798_v1  ;;  %2495 = vmatprep.subr.bf16.mxu0 %v2494_v11  ;;  %v415_v11 = vld [vmem:[#allocation2 + $0x300] sm:$0xff]  ;;  %v417_v12 = vld [vmem:[#allocation2 + $0x310] sm:$0xff] }
  0xb2   :  { %2365 = vmatpush1.bf16.msra.mxu1 %v2364_v15  ;;  %v2378_v15 = vpack.c.bf16 %v398_v63, %v396_v62  ;;  %2497 = vmatpush3.bf16.msra.mxu0 %v2496_v16  ;;  %v2394_v63 = vpack.c.bf16 %v414_v61, %v412_v31  ;;  %v2402_v16 = vpack.c.bf16 %v422_v14, %v420_v13  ;;  %v445_v31 = vld [vmem:[#allocation2 + $0x3f0] sm:$0xff]  ;;  %v448_v61 = vld [vmem:[#allocation2 + $0x408] sm:$0xff]  ;;  %v451_v14 = vld [vmem:[#allocation2 + $0x420] sm:$0xff] }
  0xb3   :  { %2367 = vmatprep.subr.bf16.mxu1 %v2366_v18  ;;  %v800_v18 = vld [vmem:[#allocation5 + $0x10] sm:$0xff]  ;;  %2499 = vmatprep.subr.bf16.mxu0 %v2498_v17  ;;  %v419_v17 = vld [vmem:[#allocation2 + $0x320] sm:$0xff] }
 0x17e   :  { %v264_v26 = vpop.f32.mrb[0].mxu0 }
 0x17f   :  { %v265_v27 = vadd.f32 %v264_v26, %v177_v24  ;;  %v266_v28 = vpop.f32.mrb[1].mxu0  ;;  %v402_v26 = vld [vmem:[#allocation2 + $0x298] sm:$0xff] }
 0x180   :  { %v267_v29 = vadd.f32 %v266_v28, %v181_v25  ;;  %v2500_v28 = vpack.c.bf16 %v801_v20, %v800_v18  ;;  %v421_v18 = vld [vmem:[#allocation2 + $0x330] sm:$0xff]  ;;  %v424_v20 = vld [vmem:[#allocation2 + $0x348] sm:$0xff] }
 0x181   :  { %v3068_v32 = vmax.f32 %v265_v27, 0.0  ;;  %v819_v27 = vld [vmem:[#allocation5 + $0xa8] sm:$0xff] }
 0x182   :  { %v270_v30 = vpop.f32.mrb[2].mxu0  ;;  %v3070_v35 = vmax.f32 %v267_v29, 0.0  ;;  %v2380_v29 = vpack.c.bf16 %v397_v6, %v395_v0  ;;  %2501 = vmatpush3.bf16.msra.mxu0 %v2500_v28  ;;  %v411_v0 = vld [vmem:[#allocation2 + $0x2e0] sm:$0xff]  ;;  %v413_v6 = vld [vmem:[#allocation2 + $0x2f0] sm:$0xff] }
 0x183   :  { %v271_v33 = vadd.f32 %v270_v30, %v177_v24  ;;  %v272_v34 = vpop.f32.mrb[3].mxu0  ;;  %v287_v39 = vrot.slane %v3068_v32, 7  ;;  %v818_v24 = vld [vmem:[#allocation5 + $0xa0] sm:$0xff]  ;;  %v2396_v1 = vpack.c.bf16 %v413_v6, %v411_v0  ;;  %v425_v28 = vld [vmem:[#allocation2 + $0x350] sm:$0xff] }
 0x184   :  { %v273_v36 = vadd.f32 %v272_v34, %v181_v25  ;;  %v288_v42 = vrot.slane %v3070_v35, 7  ;;  %v400_v25 = vld [vmem:[#allocation2 + $0x288] sm:$0xff]  ;;  %v399_v30 = vld [vmem:[#allocation2 + $0x280] sm:$0xff] }
 0x185   :  { %v3072_v37 = vmax.f32 %v271_v33, 0.0  ;;  %v2502_v33 = vpack.c.bf16 %v819_v27, %v818_v24  ;;  %v802_v34 = vld [vmem:[#allocation5 + $0x20] sm:$0xff]  ;;  %v426_v24 = vld [vmem:[#allocation2 + $0x358] sm:$0xff] }
 0x186   :  { %v3074_v38 = vmax.f32 %v273_v36, 0.0  ;;  %v803_v36 = vld [vmem:[#allocation5 + $0x28] sm:$0xff]  ;;  %v423_v27 = vld [vmem:[#allocation2 + $0x340] sm:$0xff] }
 0x187   :  { %v281_v40 = vrot.slane %v3072_v37, 7  ;;  %2503 = vmatprep.subr.bf16.mxu0 %v2502_v33  ;;  %v2408_v33 = vpack.c.bf16 %v425_v28, %v423_v27  ;;  %v447_v6 = vld [vmem:[#allocation2 + $0x400] sm:$0xff]  ;;  %v460_v28 = vld [vmem:[#allocation2 + $0x468] sm:$0xff] }
 0x188   :  { %v282_v41 = vrot.slane %v3074_v38, 7 }
 0x189   :  { %v295_v45 = vsel %vm130_vm3, %v281_v40, %v287_v39  ;;  %v289_v56 = vsel %vm130_vm3, %v287_v39, %v281_v40  ;;  %v2382_v39 = vpack.c.bf16 %v402_v26, %v400_v25  ;;  %v401_v40 = vld [vmem:[#allocation2 + $0x290] sm:$0xff]  ;;  %v2404_v25 = vpack.c.bf16 %v421_v18, %v419_v17  ;;  %v458_v17 = vld [vmem:[#allocation2 + $0x458] sm:$0xff] }
 0x18a   :  { %v296_v50 = vsel %vm130_vm3, %v282_v41, %v288_v42  ;;  %v290_v51 = vsel %vm130_vm3, %v288_v42, %v282_v41  ;;  %v297_v4 = vmul.f32 %v3049_v47, %v295_v45  ;;  %v299_v59 = vmul.f32 %v3052_v49, %v289_v56  ;;  %v820_v41 = vld [vmem:[#allocation5 + $0xb0] sm:$0xff]  ;;  %v821_v42 = vld [vmem:[#allocation5 + $0xb8] sm:$0xff] }
 0x18b   :  { %v298_v52 = vmul.f32 %v3049_v47, %v296_v50  ;;  %v300_v55 = vmul.f32 %v3052_v49, %v290_v51  ;;  %v2504_v45 = vpack.c.bf16 %v803_v36, %v802_v34  ;;  %v2384_v46 = vpack.c.bf16 %v401_v40, %v399_v30  ;;  %v804_v51 = vld [vmem:[#allocation5 + $0x30] sm:$0xff]  ;;  %v430_v30 = vld [vmem:[#allocation2 + $0x378] sm:$0xff]  ;;  %v427_v36 = vld [vmem:[#allocation2 + $0x360] sm:$0xff] }
 0x18c   :  { %v2506_v50 = vpack.c.bf16 %v821_v42, %v820_v41  ;;  %v2406_v26 = vpack.c.bf16 %v426_v24, %v424_v20  ;;  %v432_v40 = vld [vmem:[#allocation2 + $0x388] sm:$0xff]  ;;  %v434_v41 = vld [vmem:[#allocation2 + $0x398] sm:$0xff] }
 0x18d   :  { %587 = vmatprep.mubr.f32.mxu1 %v298_v52  ;;  %v805_v52 = vld [vmem:[#allocation5 + $0x38] sm:$0xff]  ;;  %2505 = vmatpush3.bf16.msra.mxu0 %v2504_v45  ;;  %v433_v45 = vld [vmem:[#allocation2 + $0x390] sm:$0xff] }
 0x18e   :  { %588 = vmatmul.mubr.f32.vlgmr.msra.gmra.mrb[0].mxu1 %v297_v4  ;;  %v405_v4 = vld [vmem:[#allocation2 + $0x2b0] sm:$0xff]  ;;  %v2508_v56 = vpack.c.bf16 %v805_v52, %v804_v51  ;;  %2507 = vmatprep.subr.bf16.mxu0 %v2506_v50  ;;  %v435_v52 = vld [vmem:[#allocation2 + $0x3a0] sm:$0xff] }
 0x18f   :  { %2369 = vmatpush1.bf16.msra.mxu1 %v2368_v3  ;;  %593 = vmatprep.mubr.f32.mxu1 %v300_v55  ;;  %v2386_v3 = vpack.c.bf16 %v406_v44, %v404_v43  ;;  %v410_v55 = vld [vmem:[#allocation2 + $0x2d8] sm:$0xff]  ;;  %v2388_v57 = vpack.c.bf16 %v405_v4, %v403_v48  ;;  %v2414_v43 = vpack.c.bf16 %v434_v41, %v432_v40  ;;  %v431_v44 = vld [vmem:[#allocation2 + $0x380] sm:$0xff]  ;;  %v440_v4 = vld [vmem:[#allocation2 + $0x3c8] sm:$0xff] }
 0x190   :  { %2371 = vmatprep.subr.bf16.mxu1 %v2370_v5  ;;  %v822_v5 = vld [vmem:[#allocation5 + $0xc0] sm:$0xff]  ;;  %v438_v48 = vld [vmem:[#allocation2 + $0x3b8] sm:$0xff]  ;;  %v2416_v50 = vpack.c.bf16 %v433_v45, %v431_v44  ;;  %v465_v44 = vld [vmem:[#allocation2 + $0x490] sm:$0xff] }
 0x191   :  { %v2510_v23 = vpack.c.bf16 %v823_v53, %v822_v5  ;;  %2509 = vmatpush3.bf16.msra.mxu0 %v2508_v56  ;;  %v442_v5 = vld [vmem:[#allocation2 + $0x3d8] sm:$0xff]  ;;  %v441_v56 = vld [vmem:[#allocation2 + $0x3d0] sm:$0xff]  ;;  %v468_v45 = vld [vmem:[#allocation2 + $0x4a8] sm:$0xff] }
 0x192   :  { %594 = vmatmul.mubr.f32.gmra.mrb[2].mxu1 %v299_v59  ;;  %v407_v59 = vld [vmem:[#allocation2 + $0x2c0] sm:$0xff]  ;;  %v466_v40 = vld [vmem:[#allocation2 + $0x498] sm:$0xff] }
 0x193   :  { %2373 = vmatpush1.bf16.msra.mxu1 %v2372_v58  ;;  %664 = vmatprep.mubr.f32.mxu1 %v3070_v35  ;;  %v2390_v58 = vpack.c.bf16 %v410_v55, %v408_v54  ;;  %v2422_v54 = vpack.c.bf16 %v442_v5, %v440_v4  ;;  %v439_v55 = vld [vmem:[#allocation2 + $0x3c0] sm:$0xff]  ;;  %v474_v4 = vld [vmem:[#allocation2 + $0x4d8] sm:$0xff] }
 0x194   :  { %2375 = vmatprep.subr.bf16.mxu1 %v2374_v60  ;;  %v409_v60 = vld [vmem:[#allocation2 + $0x2d0] sm:$0xff]  ;;  %2511 = vmatprep.subr.bf16.mxu0 %v2510_v23  ;;  %v446_v23 = vld [vmem:[#allocation2 + $0x3f8] sm:$0xff] }
 0x195   :  { %v2392_v62 = vpack.c.bf16 %v409_v60, %v407_v59  ;;  %v443_v60 = vld [vmem:[#allocation2 + $0x3e0] sm:$0xff] }
 0x197   :  { %2377 = vmatpush1.bf16.msra.mxu1 %v2376_v10  ;;  %v2398_v10 = vpack.c.bf16 %v418_v9, %v416_v7  ;;  %v449_v7 = vld [vmem:[#allocation2 + $0x410] sm:$0xff]  ;;  %v452_v9 = vld [vmem:[#allocation2 + $0x428] sm:$0xff] }
 0x198   :  { %2379 = vmatprep.subr.bf16.mxu1 %v2378_v15  ;;  %v2400_v15 = vpack.c.bf16 %v417_v12, %v415_v11  ;;  %v2432_v11 = vpack.c.bf16 %v449_v7, %v447_v6  ;;  %v304_v12 = vrot.slane %v3070_v35, 1  ;;  %v481_v6 = vld [vmem:[#allocation2 + $0x510] sm:$0xff]  ;;  %v484_v7 = vld [vmem:[#allocation2 + $0x528] sm:$0xff] }
 0x199   :  { %v824_v35 = vld [vmem:[#allocation5 + $0xd0] sm:$0xff] }
 0x19b   :  { %2381 = vmatpush1.bf16.msra.mxu1 %v2380_v29  ;;  %v428_v29 = vld [vmem:[#allocation2 + $0x368] sm:$0xff] }
 0x19c   :  { %2383 = vmatprep.subr.bf16.mxu1 %v2382_v39  ;;  %v2410_v34 = vpack.c.bf16 %v430_v30, %v428_v29  ;;  %v429_v39 = vld [vmem:[#allocation2 + $0x370] sm:$0xff]  ;;  %v462_v29 = vld [vmem:[#allocation2 + $0x478] sm:$0xff] }
 0x19d   :  { %v2412_v42 = vpack.c.bf16 %v429_v39, %v427_v36  ;;  %v461_v36 = vld [vmem:[#allocation2 + $0x470] sm:$0xff]  ;;  %v464_v39 = vld [vmem:[#allocation2 + $0x488] sm:$0xff] }
 0x19f   :  { %2385 = vmatpush1.bf16.msra.mxu1 %v2384_v46  ;;  %v436_v46 = vld [vmem:[#allocation2 + $0x3a8] sm:$0xff] }
 0x1a0   :  { %2387 = vmatprep.subr.bf16.mxu1 %v2386_v3  ;;  %v2418_v51 = vpack.c.bf16 %v438_v48, %v436_v46  ;;  %v437_v3 = vld [vmem:[#allocation2 + $0x3b0] sm:$0xff]  ;;  %v470_v46 = vld [vmem:[#allocation2 + $0x4b8] sm:$0xff] }
 0x1a1   :  { %v2420_v53 = vpack.c.bf16 %v437_v3, %v435_v52  ;;  %v469_v52 = vld [vmem:[#allocation2 + $0x4b0] sm:$0xff]  ;;  %v472_v3 = vld [vmem:[#allocation2 + $0x4c8] sm:$0xff] }
 0x1a3   :  { %2389 = vmatpush1.bf16.msra.mxu1 %v2388_v57  ;;  %v444_v57 = vld [vmem:[#allocation2 + $0x3e8] sm:$0xff] }
 0x1a4   :  { %2391 = vmatprep.subr.bf16.mxu1 %v2390_v58  ;;  %v2424_v58 = vpack.c.bf16 %v441_v56, %v439_v55  ;;  %v2426_v59 = vpack.c.bf16 %v446_v23, %v444_v57  ;;  %v473_v55 = vld [vmem:[#allocation2 + $0x4d0] sm:$0xff]  ;;  %v476_v56 = vld [vmem:[#allocation2 + $0x4e8] sm:$0xff]  ;;  %v478_v57 = vld [vmem:[#allocation2 + $0x4f8] sm:$0xff] }
 0x1a7   :  { %2393 = vmatpush1.bf16.msra.mxu1 %v2392_v62  ;;  %v450_v62 = vld [vmem:[#allocation2 + $0x418] sm:$0xff] }
 0x1a8   :  { %2395 = vmatprep.subr.bf16.mxu1 %v2394_v63  ;;  %v2428_v63 = vpack.c.bf16 %v445_v31, %v443_v60  ;;  %v2430_v0 = vpack.c.bf16 %v450_v62, %v448_v61  ;;  %v477_v60 = vld [vmem:[#allocation2 + $0x4f0] sm:$0xff]  ;;  %v480_v31 = vld [vmem:[#allocation2 + $0x508] sm:$0xff]  ;;  %v482_v61 = vld [vmem:[#allocation2 + $0x518] sm:$0xff] }
 0x1ab   :  { %2397 = vmatpush1.bf16.msra.mxu1 %v2396_v1  ;;  %v454_v1 = vld [vmem:[#allocation2 + $0x438] sm:$0xff] }
 0x1ac   :  { %2399 = vmatprep.subr.bf16.mxu1 %v2398_v10  ;;  %v305_v10 = vrot.slane %v3074_v38, 1  ;;  %v2434_v13 = vpack.c.bf16 %v454_v1, %v452_v9  ;;  %v486_v9 = vld [vmem:[#allocation2 + $0x538] sm:$0xff] }
 0x1ae   :  { %v306_v18 = vsel %vm138_vm2, %v304_v12, %v305_v10 }
 0x1af   :  { %2401 = vmatpush1.bf16.msra.mxu1 %v2400_v15  ;;  %v453_v15 = vld [vmem:[#allocation2 + $0x430] sm:$0xff]  ;;  %v316_v27 = vmul.f32 %v3004_v8, %v306_v18 }
 0x1b0   :  { %2403 = vmatprep.subr.bf16.mxu1 %v2402_v16  ;;  %v456_v16 = vld [vmem:[#allocation2 + $0x448] sm:$0xff]  ;;  %v2436_v20 = vpack.c.bf16 %v453_v15, %v451_v14  ;;  %v485_v14 = vld [vmem:[#allocation2 + $0x530] sm:$0xff] }
 0x1b1   :  { %v2438_v24 = vpack.c.bf16 %v458_v17, %v456_v16  ;;  %v488_v15 = vld [vmem:[#allocation2 + $0x548] sm:$0xff]  ;;  %v490_v16 = vld [vmem:[#allocation2 + $0x558] sm:$0xff] }
 0x1b2   :  { %v2470_v18 = vpack.c.bf16 %v490_v16, %v488_v15  ;;  %v810_v15 = vld [vmem:[#allocation5 + $0x60] sm:$0xff]  ;;  %v811_v16 = vld [vmem:[#allocation5 + $0x68] sm:$0xff] }
 0x1b3   :  { %2405 = vmatpush1.bf16.msra.mxu1 %v2404_v25  ;;  %v455_v25 = vld [vmem:[#allocation2 + $0x440] sm:$0xff] }
 0x1b4   :  { %2407 = vmatprep.subr.bf16.mxu1 %v2406_v26  ;;  %v457_v26 = vld [vmem:[#allocation2 + $0x450] sm:$0xff] }
 0x1b5   :  { %v2440_v30 = vpack.c.bf16 %v457_v26, %v455_v25  ;;  %v492_v25 = vld [vmem:[#allocation2 + $0x568] sm:$0xff]  ;;  %v494_v26 = vld [vmem:[#allocation2 + $0x578] sm:$0xff] }
 0x1b7   :  { %2409 = vmatpush1.bf16.msra.mxu1 %v2408_v33  ;;  %v2442_v33 = vpack.c.bf16 %v462_v29, %v460_v28  ;;  %v2474_v28 = vpack.c.bf16 %v494_v26, %v492_v25  ;;  %v491_v29 = vld [vmem:[#allocation2 + $0x560] sm:$0xff]  ;;  %v812_v25 = vld [vmem:[#allocation5 + $0x70] sm:$0xff]  ;;  %v813_v26 = vld [vmem:[#allocation5 + $0x78] sm:$0xff] }
 0x1b8   :  { %2411 = vmatprep.subr.bf16.mxu1 %v2410_v34  ;;  %v459_v34 = vld [vmem:[#allocation2 + $0x460] sm:$0xff] }
 0x1b9   :  { %v2444_v41 = vpack.c.bf16 %v461_v36, %v459_v34  ;;  %v498_v34 = vld [vmem:[#allocation2 + $0x598] sm:$0xff] }
 0x1bb   :  { %2413 = vmatpush1.bf16.msra.mxu1 %v2412_v42  ;;  %v2446_v42 = vpack.c.bf16 %v466_v40, %v464_v39  ;;  %v495_v40 = vld [vmem:[#allocation2 + $0x580] sm:$0xff] }
 0x1bc   :  { %2415 = vmatprep.subr.bf16.mxu1 %v2414_v43  ;;  %v463_v43 = vld [vmem:[#allocation2 + $0x480] sm:$0xff] }
 0x1bd   :  { %v2448_v48 = vpack.c.bf16 %v465_v44, %v463_v43  ;;  %v502_v43 = vld [vmem:[#allocation2 + $0x5b8] sm:$0xff] }
 0x1bf   :  { %2417 = vmatpush1.bf16.msra.mxu1 %v2416_v50  ;;  %v2450_v50 = vpack.c.bf16 %v470_v46, %v468_v45  ;;  %v499_v46 = vld [vmem:[#allocation2 + $0x5a0] sm:$0xff] }
 0x1c0   :  { %2419 = vmatprep.subr.bf16.mxu1 %v2418_v51  ;;  %v467_v51 = vld [vmem:[#allocation2 + $0x4a0] sm:$0xff] }
 0x1c1   :  { %v2452_v5 = vpack.c.bf16 %v469_v52, %v467_v51  ;;  %v506_v51 = vld [vmem:[#allocation2 + $0x5d8] sm:$0xff] }
 0x1c3   :  { %2421 = vmatpush1.bf16.msra.mxu1 %v2420_v53  ;;  %v2454_v53 = vpack.c.bf16 %v474_v4, %v472_v3  ;;  %v503_v4 = vld [vmem:[#allocation2 + $0x5c0] sm:$0xff] }
 0x1c4   :  { %2423 = vmatprep.subr.bf16.mxu1 %v2422_v54  ;;  %v471_v54 = vld [vmem:[#allocation2 + $0x4c0] sm:$0xff] }
 0x1c5   :  { %v2456_v23 = vpack.c.bf16 %v473_v55, %v471_v54  ;;  %v510_v54 = vld [vmem:[#allocation2 + $0x5f8] sm:$0xff] }
 0x1c7   :  { %2425 = vmatpush1.bf16.msra.mxu1 %v2424_v58  ;;  %v2458_v58 = vpack.c.bf16 %v478_v57, %v476_v56  ;;  %v507_v57 = vld [vmem:[#allocation2 + $0x5e0] sm:$0xff] }
 0x1c8   :  { %2427 = vmatprep.subr.bf16.mxu1 %v2426_v59  ;;  %v475_v59 = vld [vmem:[#allocation2 + $0x4e0] sm:$0xff] }
 0x1c9   :  { %v2460_v62 = vpack.c.bf16 %v477_v60, %v475_v59  ;;  %v301_v59 = vrot.slane %v3068_v32, 1 }
 0x1cb   :  { %2429 = vmatpush1.bf16.msra.mxu1 %v2428_v63  ;;  %v2462_v63 = vpack.c.bf16 %v482_v61, %v480_v31  ;;  %v314_v61 = vsel %vm138_vm2, %v305_v10, %v304_v12  ;;  %v808_v10 = vld [vmem:[#allocation5 + $0x50] sm:$0xff]  ;;  %v809_v12 = vld [vmem:[#allocation5 + $0x58] sm:$0xff] }
 0x1cc   :  { %2431 = vmatprep.subr.bf16.mxu1 %v2430_v0  ;;  %v479_v0 = vld [vmem:[#allocation2 + $0x500] sm:$0xff] }
 0x1cd   :  { %v2464_v1 = vpack.c.bf16 %v481_v6, %v479_v0  ;;  %v806_v0 = vld [vmem:[#allocation5 + $0x40] sm:$0xff]  ;;  %v807_v6 = vld [vmem:[#allocation5 + $0x48] sm:$0xff] }
 0x1ce   :  { %665 = vmatmul.mubr.f32.vlgmr.msra.gmra.mrb[0].mxu1 %v3068_v32 }
 0x1cf   :  { %670 = vmatprep.mubr.f32.mxu1 %v3074_v38  ;;  %2433 = vmatpush1.bf16.msra.mxu1 %v2432_v11  ;;  %v2466_v11 = vpack.c.bf16 %v486_v9, %v484_v7  ;;  %v2512_v7 = vpack.c.bf16 %v807_v6, %v806_v0  ;;  %v825_v38 = vld [vmem:[#allocation5 + $0xd8] sm:$0xff] }
 0x1d0   :  { %2435 = vmatprep.subr.bf16.mxu1 %v2434_v13  ;;  %v483_v13 = vld [vmem:[#allocation2 + $0x520] sm:$0xff]  ;;  %v2514_v9 = vpack.c.bf16 %v825_v38, %v824_v35  ;;  %v833_v35 = vld [vmem:[#allocation5 + $0x118] sm:$0xff] }
 0x1d1   :  { %v2468_v17 = vpack.c.bf16 %v485_v14, %v483_v13  ;;  %2513 = vmatpush3.bf16.msra.mxu0 %v2512_v7  ;;  %v827_v13 = vld [vmem:[#allocation5 + $0xe8] sm:$0xff]  ;;  %v832_v7 = vld [vmem:[#allocation5 + $0x110] sm:$0xff] }
 0x1d2   :  { %671 = vmatmul.mubr.f32.gmra.mrb[2].mxu1 %v3072_v37  ;;  %2515 = vmatprep.subr.bf16.mxu0 %v2514_v9 }
 0x1d3   :  { %2437 = vmatpush1.bf16.msra.mxu1 %v2436_v20  ;;  %741 = vmatprep.mubr.f32.mxu1 %v316_v27  ;;  %v487_v20 = vld [vmem:[#allocation2 + $0x540] sm:$0xff] }
 0x1d4   :  { %2439 = vmatprep.subr.bf16.mxu1 %v2438_v24  ;;  %v489_v24 = vld [vmem:[#allocation2 + $0x550] sm:$0xff] }
 0x1d5   :  { %v2472_v27 = vpack.c.bf16 %v489_v24, %v487_v20  ;;  %v829_v20 = vld [vmem:[#allocation5 + $0xf8] sm:$0xff] }
 0x1d7   :  { %2441 = vmatpush1.bf16.msra.mxu1 %v2440_v30  ;;  %v493_v30 = vld [vmem:[#allocation2 + $0x570] sm:$0xff] }
 0x1d8   :  { %2443 = vmatprep.subr.bf16.mxu1 %v2442_v33  ;;  %v496_v33 = vld [vmem:[#allocation2 + $0x588] sm:$0xff]  ;;  %v2476_v36 = vpack.c.bf16 %v493_v30, %v491_v29 }
 0x1d9   :  { %v2478_v39 = vpack.c.bf16 %v498_v34, %v496_v33  ;;  %v847_v29 = vld [vmem:[#allocation5 + $0x188] sm:$0xff]  ;;  %v511_v33 = vld [vmem:[%s3581_s4] sm:$0x3] }
 0x1da   :  { %v516_v34 = vrot.slane %v511_v33, %v176_v19 }
 0x1db   :  { %2445 = vmatpush1.bf16.msra.mxu1 %v2444_v41  ;;  %v497_v41 = vld [vmem:[#allocation2 + $0x590] sm:$0xff] }
 0x1dc   :  { %2447 = vmatprep.subr.bf16.mxu1 %v2446_v42  ;;  %v500_v42 = vld [vmem:[#allocation2 + $0x5a8] sm:$0xff]  ;;  %v2480_v44 = vpack.c.bf16 %v497_v41, %v495_v40 }
 0x1dd   :  { %v2482_v45 = vpack.c.bf16 %v502_v43, %v500_v42 }
 0x1df   :  { %2449 = vmatpush1.bf16.msra.mxu1 %v2448_v48  ;;  %v501_v48 = vld [vmem:[#allocation2 + $0x5b0] sm:$0xff] }
 0x1e0   :  { %2451 = vmatprep.subr.bf16.mxu1 %v2450_v50  ;;  %v504_v50 = vld [vmem:[#allocation2 + $0x5c8] sm:$0xff]  ;;  %v2484_v52 = vpack.c.bf16 %v501_v48, %v499_v46 }
 0x1e1   :  { %v2486_v3 = vpack.c.bf16 %v506_v51, %v504_v50 }
 0x1e3   :  { %2453 = vmatpush1.bf16.msra.mxu1 %v2452_v5  ;;  %v505_v5 = vld [vmem:[#allocation2 + $0x5d0] sm:$0xff] }
 0x1e4   :  { %2455 = vmatprep.subr.bf16.mxu1 %v2454_v53  ;;  %v508_v53 = vld [vmem:[#allocation2 + $0x5e8] sm:$0xff]  ;;  %v2488_v55 = vpack.c.bf16 %v505_v5, %v503_v4 }
 0x1e5   :  { %v2490_v56 = vpack.c.bf16 %v510_v54, %v508_v53 }
 0x1e7   :  { %2457 = vmatpush1.bf16.msra.mxu1 %v2456_v23  ;;  %v509_v23 = vld [vmem:[#allocation2 + $0x5f0] sm:$0xff] }
 0x1e8   :  { %2459 = vmatprep.subr.bf16.mxu1 %v2458_v58  ;;  %v302_v58 = vrot.slane %v3072_v37, 1  ;;  %v2492_v60 = vpack.c.bf16 %v509_v23, %v507_v57 }
 0x1ea   :  { %v303_v31 = vsel %vm138_vm2, %v301_v59, %v302_v58  ;;  %v313_v37 = vsel %vm138_vm2, %v302_v58, %v301_v59  ;;  %v848_v58 = vld [vmem:[#allocation5 + $0x190] sm:$0xff]  ;;  %v849_v59 = vld [vmem:[#allocation5 + $0x198] sm:$0xff] }
 0x1eb   :  { %2461 = vmatpush1.bf16.msra.mxu1 %v2460_v62  ;;  %v315_v62 = vmul.f32 %v3004_v8, %v303_v31  ;;  %v317_v32 = vmul.f32 %v3027_v21, %v313_v37  ;;  %v2530_v6 = vpack.c.bf16 %v849_v59, %v848_v58  ;;  %v862_v58 = vld [vmem:[#allocation5 + $0x200] sm:$0xff]  ;;  %v863_v59 = vld [vmem:[#allocation5 + $0x208] sm:$0xff] }
 0x1ec   :  { %2463 = vmatprep.subr.bf16.mxu1 %v2462_v63  ;;  %v318_v63 = vmul.f32 %v3027_v21, %v314_v61 }
 0x1ef   :  { %2465 = vmatpush1.bf16.msra.mxu1 %v2464_v1  ;;  %v2516_v1 = vpack.c.bf16 %v809_v12, %v808_v10  ;;  %v850_v10 = vld [vmem:[#allocation5 + $0x1a0] sm:$0xff]  ;;  %v851_v12 = vld [vmem:[#allocation5 + $0x1a8] sm:$0xff] }
 0x1f0   :  { %2467 = vmatprep.subr.bf16.mxu1 %v2466_v11  ;;  %v826_v11 = vld [vmem:[#allocation5 + $0xe0] sm:$0xff] }
 0x1f1   :  { %2517 = vmatpush3.bf16.msra.mxu0 %v2516_v1  ;;  %v2518_v14 = vpack.c.bf16 %v827_v13, %v826_v11  ;;  %v2532_v1 = vpack.c.bf16 %v833_v35, %v832_v7  ;;  %v2534_v13 = vpack.c.bf16 %v851_v12, %v850_v10  ;;  %v883_v7 = vld [vmem:[#allocation5 + $0x2a8] sm:$0xff]  ;;  %v866_v10 = vld [vmem:[#allocation5 + $0x220] sm:$0xff] }
 0x1f2   :  { %v867_v12 = vld [vmem:[#allocation5 + $0x228] sm:$0xff] }
 0x1f3   :  { %2469 = vmatpush1.bf16.msra.mxu1 %v2468_v17  ;;  %v2520_v17 = vpack.c.bf16 %v811_v16, %v810_v15  ;;  %2519 = vmatprep.subr.bf16.mxu0 %v2518_v14  ;;  %v834_v14 = vld [vmem:[#allocation5 + $0x120] sm:$0xff]  ;;  %v835_v15 = vld [vmem:[#allocation5 + $0x128] sm:$0xff]  ;;  %v852_v16 = vld [vmem:[#allocation5 + $0x1b0] sm:$0xff] }
 0x1f4   :  { %2471 = vmatprep.subr.bf16.mxu1 %v2470_v18  ;;  %v828_v18 = vld [vmem:[#allocation5 + $0xf0] sm:$0xff] }
 0x1f5   :  { %2521 = vmatpush3.bf16.msra.mxu0 %v2520_v17  ;;  %v2522_v24 = vpack.c.bf16 %v829_v20, %v828_v18  ;;  %v853_v17 = vld [vmem:[#allocation5 + $0x1b8] sm:$0xff]  ;;  %v2536_v18 = vpack.c.bf16 %v835_v15, %v834_v14  ;;  %v2568_v14 = vpack.c.bf16 %v867_v12, %v866_v10  ;;  %v868_v15 = vld [vmem:[#allocation5 + $0x230] sm:$0xff] }
 0x1f6   :  { %v2538_v20 = vpack.c.bf16 %v853_v17, %v852_v16  ;;  %v886_v16 = vld [vmem:[#allocation5 + $0x2c0] sm:$0xff]  ;;  %v887_v17 = vld [vmem:[#allocation5 + $0x2c8] sm:$0xff]  ;;  %v1172_v12 = vld [vmem:[%s3584_s7 + $0xc0] sm:$0xff] }
 0x1f7   :  { %2473 = vmatpush1.bf16.msra.mxu1 %v2472_v27  ;;  %v2524_v27 = vpack.c.bf16 %v813_v26, %v812_v25  ;;  %2523 = vmatprep.subr.bf16.mxu0 %v2522_v24  ;;  %v836_v24 = vld [vmem:[#allocation5 + $0x130] sm:$0xff]  ;;  %v837_v25 = vld [vmem:[#allocation5 + $0x138] sm:$0xff]  ;;  %v854_v26 = vld [vmem:[#allocation5 + $0x1c0] sm:$0xff] }
 0x1f8   :  { %2475 = vmatprep.subr.bf16.mxu1 %v2474_v28  ;;  %v846_v28 = vld [vmem:[#allocation5 + $0x180] sm:$0xff] }
 0x1f9   :  { %2525 = vmatpush3.bf16.msra.mxu0 %v2524_v27  ;;  %v2526_v30 = vpack.c.bf16 %v847_v29, %v846_v28  ;;  %v855_v27 = vld [vmem:[#allocation5 + $0x1c8] sm:$0xff]  ;;  %v2540_v28 = vpack.c.bf16 %v837_v25, %v836_v24  ;;  %v870_v24 = vld [vmem:[#allocation5 + $0x240] sm:$0xff] }
 0x1fa   :  { %v2542_v29 = vpack.c.bf16 %v855_v27, %v854_v26  ;;  %v871_v25 = vld [vmem:[#allocation5 + $0x248] sm:$0xff]  ;;  %v889_v26 = vld [vmem:[#allocation5 + $0x2d8] sm:$0xff] }
 0x1fb   :  { %2477 = vmatpush1.bf16.msra.mxu1 %v2476_v36  ;;  %2527 = vmatprep.subr.bf16.mxu0 %v2526_v30  ;;  %v520_v36 = vrot.slane %v511_v33, %v180_v22  ;;  %v838_v30 = vld [vmem:[#allocation5 + $0x140] sm:$0xff]  ;;  %v839_v33 = vld [vmem:[#allocation5 + $0x148] sm:$0xff]  ;;  %v2576_v27 = vpack.c.bf16 %v871_v25, %v870_v24  ;;  %v1176_v24 = vld [vmem:[%s3584_s7 + $0xe0] sm:$0xff] }
 0x1fc   :  { %2479 = vmatprep.subr.bf16.mxu1 %v2478_v39  ;;  %v1177_v25 = vld [vmem:[%s3584_s7 + $0xe8] sm:$0xff] }
 0x1ff   :  { %2481 = vmatpush1.bf16.msra.mxu1 %v2480_v44 }
 0x200   :  { %2483 = vmatprep.subr.bf16.mxu1 %v2482_v45 }
 0x203   :  { %2485 = vmatpush1.bf16.msra.mxu1 %v2484_v52 }
 0x204   :  { %2487 = vmatprep.subr.bf16.mxu1 %v2486_v3 }
 0x207   :  { %2489 = vmatpush1.bf16.msra.mxu1 %v2488_v55  ;;  %v830_v55 = vld [vmem:[#allocation5 + $0x100] sm:$0xff] }
 0x208   :  { %2491 = vmatprep.subr.bf16.mxu1 %v2490_v56  ;;  %v831_v56 = vld [vmem:[#allocation5 + $0x108] sm:$0xff] }
 0x209   :  { %v2528_v37 = vpack.c.bf16 %v831_v56, %v830_v55  ;;  %v879_v55 = vld [vmem:[#allocation5 + $0x288] sm:$0xff] }
 0x20b   :  { %2493 = vmatpush1.bf16.msra.mxu1 %v2492_v60 }
 0x20e   :  { %742 = vmatmul.mubr.f32.vlgmr.msra.gmra.mrb[0].mxu1 %v315_v62 }
 0x20f   :  { %747 = vmatprep.mubr.f32.mxu1 %v318_v63 }
 0x212   :  { %748 = vmatmul.mubr.f32.gmra.mrb[2].mxu1 %v317_v32 }
 0x2e1   :  { %v743_v39 = vpop.f32.mrb[0].mxu1 }
 0x2e2   :  { %v2766_v40 = vadd.f32 %v743_v39, %v516_v34  ;;  %v745_v41 = vpop.f32.mrb[1].mxu1  ;;  %v2544_v39 = vpack.c.bf16 %v839_v33, %v838_v30  ;;  %v890_v30 = vld [vmem:[#allocation5 + $0x2e0] sm:$0xff]  ;;  %v891_v33 = vld [vmem:[#allocation5 + $0x2e8] sm:$0xff] }
 0x2e3   :  { %v2767_v42 = vadd.f32 %v745_v41, %v520_v36  ;;  %v840_v41 = vld [vmem:[#allocation5 + $0x150] sm:$0xff] }
 0x2e4   :  { %v3119_v44 = vmax.f32 %v2766_v40, 0.0 }
 0x2e5   :  { %v749_v43 = vpop.f32.mrb[2].mxu1  ;;  %v755_v48 = vmax.f32 %v2767_v42, 0.0  ;;  %v841_v42 = vld [vmem:[#allocation5 + $0x158] sm:$0xff] }
 0x2e6   :  { %v2768_v45 = vadd.f32 %v749_v43, %v516_v34  ;;  %v751_v46 = vpop.f32.mrb[3].mxu1  ;;  %v766_v19 = vrot.slane %v3119_v44, 7  ;;  %v780_v2 = vrot.slane %v3119_v44, 1  ;;  %v856_v34 = vld [vmem:[#allocation5 + $0x1d0] sm:$0xff]  ;;  %v858_v43 = vld [vmem:[#allocation5 + $0x1e0] sm:$0xff] }
 0x2e7   :  { %v2769_v50 = vadd.f32 %v751_v46, %v520_v36  ;;  %v767_v4 = vrot.slane %v755_v48, 7  ;;  %v783_v5 = vrot.slane %v755_v48, 1  ;;  %v857_v36 = vld [vmem:[#allocation5 + $0x1d8] sm:$0xff]  ;;  %v2548_v46 = vpack.c.bf16 %v841_v42, %v840_v41  ;;  %v892_v41 = vld [vmem:[#allocation5 + $0x2f0] sm:$0xff] }
 0x2e8   :  { %v3121_v51 = vmax.f32 %v2768_v45, 0.0  ;;  %v2546_v40 = vpack.c.bf16 %v857_v36, %v856_v34  ;;  %v859_v45 = vld [vmem:[#allocation5 + $0x1e8] sm:$0xff]  ;;  %v2582_v36 = vpack.c.bf16 %v891_v33, %v890_v30  ;;  %v893_v42 = vld [vmem:[#allocation5 + $0x2f8] sm:$0xff]  ;;  %v1162_v33 = vld [vmem:[%s3584_s7 + $0x70] sm:$0xff] }
 0x2e9   :  { %v3123_v52 = vmax.f32 %v2769_v50, 0.0  ;;  %v842_v50 = vld [vmem:[#allocation5 + $0x160] sm:$0xff] }
 0x2ea   :  { %v760_v22 = vrot.slane %v3121_v51, 7  ;;  %v781_v3 = vrot.slane %v3121_v51, 1 }
 0x2eb   :  { %v761_v53 = vrot.slane %v3123_v52, 7  ;;  %v784_v54 = vrot.slane %v3123_v52, 1 }
 0x2ec   :  { %v774_v57 = vsel %vm130_vm3, %v760_v22, %v766_v19  ;;  %v3133_v23 = vsel %vm138_vm2, %v780_v2, %v781_v3  ;;  %v768_v60 = vsel %vm130_vm3, %v766_v19, %v760_v22  ;;  %v3137_v31 = vsel %vm138_vm2, %v781_v3, %v780_v2  ;;  %v843_v19 = vld [vmem:[#allocation5 + $0x168] sm:$0xff]  ;;  %v860_v2 = vld [vmem:[#allocation5 + $0x1f0] sm:$0xff]  ;;  %v861_v22 = vld [vmem:[#allocation5 + $0x1f8] sm:$0xff] }
 0x2ed   :  { %v775_v61 = vsel %vm130_vm3, %v761_v53, %v767_v4  ;;  %v769_v62 = vsel %vm130_vm3, %v767_v4, %v761_v53  ;;  %v3143_v32 = vsel %vm138_vm2, %v783_v5, %v784_v54  ;;  %v776_v0 = vmul.f32 %v3049_v47, %v774_v57  ;;  %v845_v53 = vld [vmem:[#allocation5 + $0x178] sm:$0xff] }
 0x2ee   :  { %v777_v63 = vmul.f32 %v3049_v47, %v775_v61  ;;  %v3147_v38 = vsel %vm138_vm2, %v784_v54, %v783_v5  ;;  %v779_v9 = vmul.f32 %v3052_v49, %v769_v62  ;;  %v778_v11 = vmul.f32 %v3052_v49, %v768_v60  ;;  %v844_v5 = vld [vmem:[#allocation5 + $0x170] sm:$0xff]  ;;  %v878_v54 = vld [vmem:[#allocation5 + $0x280] sm:$0xff]  ;;  %v881_v61 = vld [vmem:[#allocation5 + $0x298] sm:$0xff] }
 0x2ef   :  { %v2552_v3 = vpack.c.bf16 %v843_v19, %v842_v50  ;;  %v2554_v4 = vpack.c.bf16 %v861_v22, %v860_v2  ;;  %v2556_v56 = vpack.c.bf16 %v845_v53, %v844_v5  ;;  %v2558_v57 = vpack.c.bf16 %v879_v55, %v878_v54  ;;  %v880_v60 = vld [vmem:[#allocation5 + $0x290] sm:$0xff]  ;;  %v1167_v53 = vld [vmem:[%s3584_s7 + $0x98] sm:$0xff] }
 0x2f0   :  { %965 = vmatprep.mubr.f32.mxu0 %v777_v63  ;;  %v2560_v62 = vpack.c.bf16 %v863_v59, %v862_v58  ;;  %v2562_v63 = vpack.c.bf16 %v881_v61, %v880_v60  ;;  %v794_v19 = vmul.f32 %v3004_v8, %v3133_v23  ;;  %v797_v2 = vmul.f32 %v3027_v21, %v3147_v38  ;;  %v1148_v23 = vld [vmem:[%s3584_s7] sm:$0xff]  ;;  %v1149_v38 = vld [vmem:[%s3584_s7 + $0x8] sm:$0xff] }
 0x2f1   :  { %966 = vmatmul.mubr.f32.vlgmr.msra.gmra.mrb[4].mxu0 %v776_v0  ;;  %v865_v0 = vld [vmem:[#allocation5 + $0x218] sm:$0xff]  ;;  %v796_v22 = vmul.f32 %v3027_v21, %v3137_v31  ;;  %v1166_v31 = vld [vmem:[%s3584_s7 + $0x90] sm:$0xff]  ;;  %v2592_v54 = vpack.c.bf16 %v1149_v38, %v1148_v23  ;;  %v1168_v58 = vld [vmem:[%s3584_s7 + $0xa0] sm:$0xff] }
 0x2f2   :  { %2529 = vmatpush3.bf16.msra.mxu0 %v2528_v37  ;;  %970 = vmatprep.mubr.f32.mxu0 %v779_v9  ;;  %v864_v37 = vld [vmem:[#allocation5 + $0x210] sm:$0xff]  ;;  %v2594_v55 = vpack.c.bf16 %v1167_v53, %v1166_v31  ;;  %v1169_v59 = vld [vmem:[%s3584_s7 + $0xa8] sm:$0xff] }
 0x2f3   :  { %2531 = vmatprep.subr.bf16.mxu0 %v2530_v6  ;;  %v882_v6 = vld [vmem:[#allocation5 + $0x2a0] sm:$0xff]  ;;  %v2564_v35 = vpack.c.bf16 %v865_v0, %v864_v37  ;;  %v2598_v61 = vpack.c.bf16 %v1169_v59, %v1168_v58  ;;  %v1171_v0 = vld [vmem:[%s3584_s7 + $0xb8] sm:$0xff] }
 0x2f4   :  { %v2566_v9 = vpack.c.bf16 %v883_v7, %v882_v6  ;;  %v1170_v37 = vld [vmem:[%s3584_s7 + $0xb0] sm:$0xff] }
 0x2f5   :  { %971 = vmatmul.mubr.f32.gmra.mrb[6].mxu0 %v778_v11  ;;  %v884_v11 = vld [vmem:[#allocation5 + $0x2b0] sm:$0xff]  ;;  %v2602_v7 = vpack.c.bf16 %v1171_v0, %v1170_v37 }
 0x2f6   :  { %2533 = vmatpush3.bf16.msra.mxu0 %v2532_v1  ;;  %1040 = vmatprep.mubr.f32.mxu0 %v755_v48  ;;  %v2550_v48 = vpack.c.bf16 %v859_v45, %v858_v43  ;;  %v795_v1 = vmul.f32 %v3004_v8, %v3143_v32  ;;  %v888_v32 = vld [vmem:[#allocation5 + $0x2d0] sm:$0xff]  ;;  %v2586_v45 = vpack.c.bf16 %v893_v42, %v892_v41 }
 0x2f7   :  { %2535 = vmatprep.subr.bf16.mxu0 %v2534_v13  ;;  %v885_v13 = vld [vmem:[#allocation5 + $0x2b8] sm:$0xff] }
 0x2fa   :  { %2537 = vmatpush3.bf16.msra.mxu0 %v2536_v18 }
 0x2fb   :  { %2539 = vmatprep.subr.bf16.mxu0 %v2538_v20  ;;  %v2574_v20 = vpack.c.bf16 %v887_v17, %v886_v16  ;;  %v1158_v17 = vld [vmem:[%s3584_s7 + $0x50] sm:$0xff] }
 0x2fe   :  { %2541 = vmatpush3.bf16.msra.mxu0 %v2540_v28  ;;  %v872_v28 = vld [vmem:[#allocation5 + $0x250] sm:$0xff] }
 0x2ff   :  { %2543 = vmatprep.subr.bf16.mxu0 %v2542_v29  ;;  %v873_v29 = vld [vmem:[#allocation5 + $0x258] sm:$0xff] }
 0x300   :  { %v2580_v34 = vpack.c.bf16 %v873_v29, %v872_v28  ;;  %v1178_v28 = vld [vmem:[%s3584_s7 + $0xf0] sm:$0xff]  ;;  %v1179_v29 = vld [vmem:[%s3584_s7 + $0xf8] sm:$0xff] }
 0x301   :  { %v2618_v30 = vpack.c.bf16 %v1179_v29, %v1178_v28  ;;  %v1191_v28 = vld [vmem:[%s3584_s7 + $0x158] sm:$0xff] }
 0x302   :  { %2545 = vmatpush3.bf16.msra.mxu0 %v2544_v39  ;;  %v874_v39 = vld [vmem:[#allocation5 + $0x260] sm:$0xff] }
 0x303   :  { %2547 = vmatprep.subr.bf16.mxu0 %v2546_v40  ;;  %v875_v40 = vld [vmem:[#allocation5 + $0x268] sm:$0xff] }
 0x304   :  { %v2584_v43 = vpack.c.bf16 %v875_v40, %v874_v39  ;;  %v1180_v39 = vld [vmem:[%s3584_s7 + $0x100] sm:$0xff]  ;;  %v1181_v40 = vld [vmem:[%s3584_s7 + $0x108] sm:$0xff] }
 0x305   :  { %v2622_v41 = vpack.c.bf16 %v1181_v40, %v1180_v39  ;;  %v1195_v39 = vld [vmem:[%s3584_s7 + $0x178] sm:$0xff] }
 0x306   :  { %2549 = vmatpush3.bf16.msra.mxu0 %v2548_v46  ;;  %v876_v46 = vld [vmem:[#allocation5 + $0x270] sm:$0xff] }
 0x307   :  { %2551 = vmatprep.subr.bf16.mxu0 %v2550_v48  ;;  %v877_v48 = vld [vmem:[#allocation5 + $0x278] sm:$0xff] }
 0x308   :  { %v2588_v50 = vpack.c.bf16 %v877_v48, %v876_v46 }
 0x30a   :  { %2553 = vmatpush3.bf16.msra.mxu0 %v2552_v3  ;;  %v1164_v3 = vld [vmem:[%s3584_s7 + $0x80] sm:$0xff] }
 0x30b   :  { %2555 = vmatprep.subr.bf16.mxu0 %v2554_v4  ;;  %v1165_v4 = vld [vmem:[%s3584_s7 + $0x88] sm:$0xff] }
 0x30c   :  { %v2590_v5 = vpack.c.bf16 %v1165_v4, %v1164_v3 }
 0x30e   :  { %2557 = vmatpush3.bf16.msra.mxu0 %v2556_v56  ;;  %v1150_v56 = vld [vmem:[%s3584_s7 + $0x10] sm:$0xff] }
 0x30f   :  { %2559 = vmatprep.subr.bf16.mxu0 %v2558_v57  ;;  %v1151_v57 = vld [vmem:[%s3584_s7 + $0x18] sm:$0xff] }
 0x310   :  { %v2596_v60 = vpack.c.bf16 %v1151_v57, %v1150_v56 }
 0x311   :  { %1041 = vmatmul.mubr.f32.vlgmr.msra.gmra.mrb[8].mxu0 %v3119_v44  ;;  %v2570_v44 = vpack.c.bf16 %v885_v13, %v884_v11  ;;  %v1156_v13 = vld [vmem:[%s3584_s7 + $0x40] sm:$0xff] }
 0x312   :  { %1045 = vmatprep.mubr.f32.mxu0 %v3123_v52  ;;  %2561 = vmatpush3.bf16.msra.mxu0 %v2560_v62  ;;  %v869_v52 = vld [vmem:[#allocation5 + $0x238] sm:$0xff]  ;;  %v1152_v62 = vld [vmem:[%s3584_s7 + $0x20] sm:$0xff] }
 0x313   :  { %2563 = vmatprep.subr.bf16.mxu0 %v2562_v63  ;;  %v2572_v18 = vpack.c.bf16 %v869_v52, %v868_v15  ;;  %v1153_v63 = vld [vmem:[%s3584_s7 + $0x28] sm:$0xff]  ;;  %v1174_v15 = vld [vmem:[%s3584_s7 + $0xd0] sm:$0xff]  ;;  %v1175_v52 = vld [vmem:[%s3584_s7 + $0xd8] sm:$0xff] }
 0x314   :  { %v2600_v6 = vpack.c.bf16 %v1153_v63, %v1152_v62  ;;  %v2610_v16 = vpack.c.bf16 %v1175_v52, %v1174_v15  ;;  %v1184_v15 = vld [vmem:[%s3584_s7 + $0x120] sm:$0xff]  ;;  %v1185_v52 = vld [vmem:[%s3584_s7 + $0x128] sm:$0xff] }
 0x315   :  { %1046 = vmatmul.mubr.f32.gmra.mrb[10].mxu0 %v3121_v51  ;;  %v2578_v51 = vpack.c.bf16 %v889_v26, %v888_v32  ;;  %v2614_v32 = vpack.c.bf16 %v1177_v25, %v1176_v24  ;;  %v1160_v26 = vld [vmem:[%s3584_s7 + $0x60] sm:$0xff]  ;;  %v1187_v24 = vld [vmem:[%s3584_s7 + $0x138] sm:$0xff] }
 0x316   :  { %2565 = vmatpush3.bf16.msra.mxu0 %v2564_v35  ;;  %1115 = vmatprep.mubr.f32.mxu0 %v795_v1  ;;  %v1154_v35 = vld [vmem:[%s3584_s7 + $0x30] sm:$0xff]  ;;  %v1173_v1 = vld [vmem:[%s3584_s7 + $0xc8] sm:$0xff] }
 0x317   :  { %2567 = vmatprep.subr.bf16.mxu0 %v2566_v9  ;;  %v1155_v9 = vld [vmem:[%s3584_s7 + $0x38] sm:$0xff]  ;;  %v2606_v11 = vpack.c.bf16 %v1173_v1, %v1172_v12 }
 0x318   :  { %v2604_v10 = vpack.c.bf16 %v1155_v9, %v1154_v35  ;;  %v1182_v9 = vld [vmem:[%s3584_s7 + $0x110] sm:$0xff] }
 0x31a   :  { %2569 = vmatpush3.bf16.msra.mxu0 %v2568_v14  ;;  %v1157_v14 = vld [vmem:[%s3584_s7 + $0x48] sm:$0xff] }
 0x31b   :  { %2571 = vmatprep.subr.bf16.mxu0 %v2570_v44  ;;  %v2608_v44 = vpack.c.bf16 %v1157_v14, %v1156_v13 }
 0x31e   :  { %2573 = vmatpush3.bf16.msra.mxu0 %v2572_v18  ;;  %v1159_v18 = vld [vmem:[%s3584_s7 + $0x58] sm:$0xff] }
 0x31f   :  { %2575 = vmatprep.subr.bf16.mxu0 %v2574_v20  ;;  %v2612_v20 = vpack.c.bf16 %v1159_v18, %v1158_v17  ;;  %v2630_v17 = vpack.c.bf16 %v1185_v52, %v1184_v15 }
 0x322   :  { %2577 = vmatpush3.bf16.msra.mxu0 %v2576_v27  ;;  %v1161_v27 = vld [vmem:[%s3584_s7 + $0x68] sm:$0xff] }
 0x323   :  { %2579 = vmatprep.subr.bf16.mxu0 %v2578_v51  ;;  %v2616_v51 = vpack.c.bf16 %v1161_v27, %v1160_v26  ;;  %v1189_v26 = vld [vmem:[%s3584_s7 + $0x148] sm:$0xff] }
 0x326   :  { %2581 = vmatpush3.bf16.msra.mxu0 %v2580_v34  ;;  %v1163_v34 = vld [vmem:[%s3584_s7 + $0x78] sm:$0xff] }
 0x327   :  { %2583 = vmatprep.subr.bf16.mxu0 %v2582_v36  ;;  %v2620_v36 = vpack.c.bf16 %v1163_v34, %v1162_v33  ;;  %v1193_v33 = vld [vmem:[%s3584_s7 + $0x168] sm:$0xff] }
 0x32a   :  { %2585 = vmatpush3.bf16.msra.mxu0 %v2584_v43 }
 0x32b   :  { %2587 = vmatprep.subr.bf16.mxu0 %v2586_v45 }
 0x32e   :  { %2589 = vmatpush3.bf16.msra.mxu0 %v2588_v50 }
 0x32f   :  { %2591 = vmatprep.subr.bf16.mxu0 %v2590_v5 }
 0x331   :  { %1116 = vmatmul.mubr.f32.vlgmr.msra.gmra.mrb[12].mxu0 %v794_v19  ;;  %v1901_v19 = vld [vmem:[%s3583_s6] ss:$0 sm:$0xff] }
 0x332   :  { %1120 = vmatprep.mubr.f32.mxu0 %v797_v2  ;;  %2593 = vmatpush3.bf16.msra.mxu0 %v2592_v54 }
 0x333   :  { %2595 = vmatprep.subr.bf16.mxu0 %v2594_v55 }
 0x335   :  { %1121 = vmatmul.mubr.f32.gmra.mrb[14].mxu0 %v796_v22 }
 0x336   :  { %2597 = vmatpush3.bf16.msra.mxu0 %v2596_v60 }
 0x337   :  { %2599 = vmatprep.subr.bf16.mxu0 %v2598_v61 }
 0x33a   :  { %2601 = vmatpush3.bf16.msra.mxu0 %v2600_v6 }
 0x33b   :  { %2603 = vmatprep.subr.bf16.mxu0 %v2602_v7 }
 0x33e   :  { %2605 = vmatpush3.bf16.msra.mxu0 %v2604_v10  ;;  %v1183_v10 = vld [vmem:[%s3584_s7 + $0x118] sm:$0xff] }
 0x33f   :  { %2607 = vmatprep.subr.bf16.mxu0 %v2606_v11 }
 0x342   :  { %2609 = vmatpush3.bf16.msra.mxu0 %v2608_v44  ;;  %v2626_v44 = vpack.c.bf16 %v1183_v10, %v1182_v9  ;;  %v1381_v10 = vld [vmem:[%s3586_s9 + $0x30] sm:$0xff] }
 0x343   :  { %2611 = vmatprep.subr.bf16.mxu0 %v2610_v16 }
 0x346   :  { %2613 = vmatpush3.bf16.msra.mxu0 %v2612_v20  ;;  %v1186_v20 = vld [vmem:[%s3584_s7 + $0x130] sm:$0xff] }
 0x347   :  { %2615 = vmatprep.subr.bf16.mxu0 %v2614_v32  ;;  %v2634_v25 = vpack.c.bf16 %v1187_v24, %v1186_v20  ;;  %v1188_v32 = vld [vmem:[%s3584_s7 + $0x140] sm:$0xff]  ;;  %v1401_v20 = vld [vmem:[%s3586_s9 + $0xd0] sm:$0xff]  ;;  %v1402_v24 = vld [vmem:[%s3586_s9 + $0xd8] sm:$0xff] }
 0x348   :  { %v2638_v27 = vpack.c.bf16 %v1189_v26, %v1188_v32  ;;  %v2674_v32 = vpack.c.bf16 %v1402_v24, %v1401_v20  ;;  %v1385_v26 = vld [vmem:[%s3586_s9 + $0x50] sm:$0xff]  ;;  %v1589_v24 = vld [vmem:[%s3588_s11 + $0x38] sm:$0xff] }
 0x349   :  { %v1588_v20 = vld [vmem:[%s3588_s11 + $0x30] sm:$0xff] }
 0x34a   :  { %2617 = vmatpush3.bf16.msra.mxu0 %v2616_v51  ;;  %v1190_v51 = vld [vmem:[%s3584_s7 + $0x150] sm:$0xff] }
 0x34b   :  { %2619 = vmatprep.subr.bf16.mxu0 %v2618_v30  ;;  %v2642_v29 = vpack.c.bf16 %v1191_v28, %v1190_v51  ;;  %v1192_v30 = vld [vmem:[%s3584_s7 + $0x160] sm:$0xff]  ;;  %v1417_v51 = vld [vmem:[%s3586_s9 + $0x150] sm:$0xff] }
 0x34c   :  { %v2646_v34 = vpack.c.bf16 %v1193_v33, %v1192_v30  ;;  %v1403_v33 = vld [vmem:[%s3586_s9 + $0xe0] sm:$0xff] }
 0x34e   :  { %2621 = vmatpush3.bf16.msra.mxu0 %v2620_v36  ;;  %v1194_v36 = vld [vmem:[%s3584_s7 + $0x170] sm:$0xff] }
 0x34f   :  { %2623 = vmatprep.subr.bf16.mxu0 %v2622_v41  ;;  %v2650_v40 = vpack.c.bf16 %v1195_v39, %v1194_v36  ;;  %v1387_v39 = vld [vmem:[%s3586_s9 + $0x60] sm:$0xff] }
 0x3c4   :  { %v1945_v42 = vpop.f32.mrb[4].mxu0 }
 0x3c5   :  { %v1946_v43 = vpop.f32.mrb[5].mxu0 }
 0x3c6   :  { %v1947_v45 = vadd.f32 %v1946_v43, %v1945_v42  ;;  %v1391_v42 = vld [vmem:[%s3586_s9 + $0x80] sm:$0xff]  ;;  %v1392_v43 = vld [vmem:[%s3586_s9 + $0x88] sm:$0xff] }
 0x3c8   :  { %v1948_v46 = vpop.f32.mrb[6].mxu0  ;;  %v968_v3 = vadd.f32 %v1947_v45, %v1901_v19  ;;  %v1375_v45 = vld [vmem:[%s3586_s9] sm:$0xff] }
 0x3c9   :  { %v1949_v48 = vpop.f32.mrb[7].mxu0 }
 0x3ca   :  { %v1950_v50 = vadd.f32 %v1949_v48, %v1948_v46  ;;  %v2654_v46 = vpack.c.bf16 %v1392_v43, %v1391_v42  ;;  %v1376_v48 = vld [vmem:[%s3586_s9 + $0x8] sm:$0xff] }
 0x3cb   :  { %v1420_v43 = vld [vmem:[%s3586_s9 + $0x168] sm:$0xff] }
 0x3cc   :  { %v973_v31 = vadd.f32 %v1950_v50, %v1901_v19  ;;  %v1407_v50 = vld [vmem:[%s3586_s9 + $0x100] sm:$0xff]  ;;  %v1408_v19 = vld [vmem:[%s3586_s9 + $0x108] sm:$0xff] }
 0x3e4   :  { %v1983_v2 = vpop.f32.mrb[8].mxu0 }
 0x3e5   :  { %v1984_v22 = vpop.f32.mrb[9].mxu0 }
 0x3e6   :  { %v1985_v4 = vadd.f32 %v1984_v22, %v1983_v2  ;;  %v2656_v2 = vpack.c.bf16 %v1376_v48, %v1375_v45  ;;  %v2686_v22 = vpack.c.bf16 %v1408_v19, %v1407_v50  ;;  %v1406_v48 = vld [vmem:[%s3586_s9 + $0xf8] sm:$0xff]  ;;  %v1389_v19 = vld [vmem:[%s3586_s9 + $0x70] sm:$0xff] }
 0x3e8   :  { %v1043_v23 = vadd.f32 %v1985_v4, %v968_v3  ;;  %v1986_v5 = vpop.f32.mrb[10].mxu0  ;;  %v1393_v3 = vld [vmem:[%s3586_s9 + $0x90] sm:$0xff]  ;;  %v1394_v4 = vld [vmem:[%s3586_s9 + $0x98] sm:$0xff]  ;;  %2687 = vmatprep.subr.bf16.mxu1 %v2686_v22 }
 0x3e9   :  { %v1987_v38 = vpop.f32.mrb[11].mxu0  ;;  %2689 = vmatpush3.bf16.msra.mxu1 %v2686_v22  ;;  %v1421_v22 = vld [vmem:[%s3586_s9 + $0x170] sm:$0xff] }
 0x3ea   :  { %v1988_v53 = vadd.f32 %v1987_v38, %v1986_v5  ;;  %v2658_v5 = vpack.c.bf16 %v1394_v4, %v1393_v3  ;;  %v1378_v38 = vld [vmem:[%s3586_s9 + $0x18] sm:$0xff] }
 0x3eb   :  { %v1422_v4 = vld [vmem:[%s3586_s9 + $0x178] sm:$0xff] }
 0x3ec   :  { %v1048_v54 = vadd.f32 %v1988_v53, %v973_v31  ;;  %v1409_v31 = vld [vmem:[%s3586_s9 + $0x110] sm:$0xff]  ;;  %v1410_v53 = vld [vmem:[%s3586_s9 + $0x118] sm:$0xff] }
 0x404   :  { %v2021_v55 = vpop.f32.mrb[12].mxu0 }
 0x405   :  { %v2022_v56 = vpop.f32.mrb[13].mxu0 }
 0x406   :  { %v2023_v57 = vadd.f32 %v2022_v56, %v2021_v55  ;;  %v2690_v55 = vpack.c.bf16 %v1410_v53, %v1409_v31  ;;  %v1395_v56 = vld [vmem:[%s3586_s9 + $0xa0] sm:$0xff] }
 0x408   :  { %v1118_v58 = vadd.f32 %v2023_v57, %v1043_v23  ;;  %v2024_v59 = vpop.f32.mrb[14].mxu0  ;;  %v1377_v23 = vld [vmem:[%s3586_s9 + $0x10] sm:$0xff]  ;;  %v1396_v57 = vld [vmem:[%s3586_s9 + $0xa8] sm:$0xff]  ;;  %2691 = vmatprep.subr.bf16.mxu1 %v2690_v55 }
 0x409   :  { %v2025_v60 = vpop.f32.mrb[15].mxu0  ;;  %2693 = vmatpush3.bf16.msra.mxu1 %v2690_v55 }
 0x40a   :  { %v1126_v61 = vmax.f32 %v1118_v58, 0.0  ;;  %v2026_v62 = vadd.f32 %v2025_v60, %v2024_v59  ;;  %v1379_v58 = vld [vmem:[%s3586_s9 + $0x20] sm:$0xff]  ;;  %v2662_v59 = vpack.c.bf16 %v1396_v57, %v1395_v56  ;;  %v1380_v60 = vld [vmem:[%s3586_s9 + $0x28] sm:$0xff] }
 0x40c   :  { %v1123_v63 = vadd.f32 %v2026_v62, %v1048_v54  ;;  %1267 = vmatprep.mubr.f32.mxu0 %v1126_v61  ;;  %v1132_v0 = vrot.slane %v1126_v61, 7  ;;  %v1139_v6 = vrot.slane %v1126_v61, 1  ;;  %v2660_v54 = vpack.c.bf16 %v1378_v38, %v1377_v23  ;;  %v1411_v61 = vld [vmem:[%s3586_s9 + $0x120] sm:$0xff]  ;;  %v1412_v62 = vld [vmem:[%s3586_s9 + $0x128] sm:$0xff] }
 0x40d   :  { %v2714_v23 = vpack.c.bf16 %v1422_v4, %v1421_v22  ;;  %v1583_v38 = vld [vmem:[%s3588_s11 + $0x8] sm:$0xff]  ;;  %v1683_v22 = vld [vmem:[%s3590_s13 + $0x20] sm:$0xff] }
 0x40e   :  { %v1127_v37 = vmax.f32 %v1123_v63, 0.0  ;;  %v2694_v63 = vpack.c.bf16 %v1412_v62, %v1411_v61 }
 0x410   :  { %v1129_v7 = vrot.slane %v1127_v37, 7  ;;  %v1140_v35 = vrot.slane %v1127_v37, 1  ;;  %2695 = vmatprep.subr.bf16.mxu1 %v2694_v63 }
 0x411   :  { %2697 = vmatpush3.bf16.msra.mxu1 %v2694_v63 }
 0x412   :  { %v1136_v12 = vsel %vm130_vm3, %v1129_v7, %v1132_v0  ;;  %v1145_v1 = vsel %vm138_vm2, %v1140_v35, %v1139_v6  ;;  %v1133_v11 = vsel %vm130_vm3, %v1132_v0, %v1129_v7  ;;  %v1141_v13 = vsel %vm138_vm2, %v1139_v6, %v1140_v35  ;;  %v1398_v0 = vld [vmem:[%s3586_s9 + $0xb8] sm:$0xff]  ;;  %v1413_v6 = vld [vmem:[%s3586_s9 + $0x130] sm:$0xff] }
 0x413   :  { %v1137_v14 = vmul.f32 %v3049_v47, %v1136_v12  ;;  %v1138_v16 = vmul.f32 %v3052_v49, %v1133_v11  ;;  %v1146_v18 = vmul.f32 %v3004_v8, %v1141_v13  ;;  %v1414_v7 = vld [vmem:[%s3586_s9 + $0x138] sm:$0xff]  ;;  %v2664_v35 = vpack.c.bf16 %v1380_v60, %v1379_v58  ;;  %v1399_v11 = vld [vmem:[%s3586_s9 + $0xc0] sm:$0xff]  ;;  %v1400_v13 = vld [vmem:[%s3586_s9 + $0xc8] sm:$0xff] }
 0x414   :  { %v1382_v12 = vld [vmem:[%s3586_s9 + $0x38] sm:$0xff]  ;;  %v2670_v52 = vpack.c.bf16 %v1400_v13, %v1399_v11 }
 0x415   :  { %1268 = vmatmul.mubr.f32.vlgmr.msra.gmra.mrb[16].mxu0 %v1137_v14  ;;  %v1415_v14 = vld [vmem:[%s3586_s9 + $0x140] sm:$0xff]  ;;  %v2668_v15 = vpack.c.bf16 %v1382_v12, %v1381_v10 }
 0x416   :  { %2625 = vmatpush3.bf16.msra.mxu0 %v2622_v41  ;;  %1272 = vmatprep.mubr.f32.mxu0 %v1127_v37  ;;  %v1147_v41 = vmul.f32 %v3027_v21, %v1145_v1  ;;  %v1397_v37 = vld [vmem:[%s3586_s9 + $0xb0] sm:$0xff]  ;;  %v2698_v1 = vpack.c.bf16 %v1414_v7, %v1413_v6 }
 0x417   :  { %2627 = vmatprep.subr.bf16.mxu0 %v2626_v44  ;;  %v2666_v9 = vpack.c.bf16 %v1398_v0, %v1397_v37 }
 0x418   :  { %2699 = vmatprep.subr.bf16.mxu1 %v2698_v1 }
 0x419   :  { %1273 = vmatmul.mubr.f32.gmra.mrb[18].mxu0 %v1138_v16  ;;  %v1383_v16 = vld [vmem:[%s3586_s9 + $0x40] sm:$0xff]  ;;  %2701 = vmatpush3.bf16.msra.mxu1 %v2698_v1 }
 0x41a   :  { %2629 = vmatpush3.bf16.msra.mxu0 %v2626_v44  ;;  %2201 = vmatprep.mubr.f32.mxu0 %v1146_v18  ;;  %v1416_v44 = vld [vmem:[%s3586_s9 + $0x148] sm:$0xff] }
 0x41b   :  { %2631 = vmatprep.subr.bf16.mxu0 %v2630_v17  ;;  %v2702_v18 = vpack.c.bf16 %v1416_v44, %v1415_v14 }
 0x41d   :  { %2703 = vmatprep.subr.bf16.mxu1 %v2702_v18 }
 0x41e   :  { %2633 = vmatpush3.bf16.msra.mxu0 %v2630_v17  ;;  %v1384_v17 = vld [vmem:[%s3586_s9 + $0x48] sm:$0xff]  ;;  %2705 = vmatpush3.bf16.msra.mxu1 %v2702_v18 }
 0x41f   :  { %2635 = vmatprep.subr.bf16.mxu0 %v2634_v25 }
 0x422   :  { %2637 = vmatpush3.bf16.msra.mxu0 %v2634_v25  ;;  %v2672_v25 = vpack.c.bf16 %v1384_v17, %v1383_v16  ;;  %v1584_v17 = vld [vmem:[%s3588_s11 + $0x10] sm:$0xff] }
 0x423   :  { %2639 = vmatprep.subr.bf16.mxu0 %v2638_v27 }
 0x426   :  { %2641 = vmatpush3.bf16.msra.mxu0 %v2638_v27  ;;  %v1386_v27 = vld [vmem:[%s3586_s9 + $0x58] sm:$0xff] }
 0x427   :  { %2643 = vmatprep.subr.bf16.mxu0 %v2642_v29  ;;  %v2676_v28 = vpack.c.bf16 %v1386_v27, %v1385_v26  ;;  %v1680_v26 = vld [vmem:[%s3590_s13 + $0x8] sm:$0xff] }
 0x42a   :  { %2645 = vmatpush3.bf16.msra.mxu0 %v2642_v29  ;;  %v1418_v29 = vld [vmem:[%s3586_s9 + $0x158] sm:$0xff] }
 0x42b   :  { %2647 = vmatprep.subr.bf16.mxu0 %v2646_v34  ;;  %v2706_v30 = vpack.c.bf16 %v1418_v29, %v1417_v51 }
 0x42d   :  { %2707 = vmatprep.subr.bf16.mxu1 %v2706_v30 }
 0x42e   :  { %2649 = vmatpush3.bf16.msra.mxu0 %v2646_v34  ;;  %v1404_v34 = vld [vmem:[%s3586_s9 + $0xe8] sm:$0xff]  ;;  %2709 = vmatpush3.bf16.msra.mxu1 %v2706_v30  ;;  %v1903_v30 = vld [vmem:[%s3587_s10] ss:$0 sm:$0xff] }
 0x42f   :  { %2651 = vmatprep.subr.bf16.mxu0 %v2650_v40  ;;  %v2678_v36 = vpack.c.bf16 %v1404_v34, %v1403_v33 }
 0x432   :  { %2653 = vmatpush3.bf16.msra.mxu0 %v2650_v40  ;;  %v1388_v40 = vld [vmem:[%s3586_s9 + $0x68] sm:$0xff] }
 0x433   :  { %2655 = vmatprep.subr.bf16.mxu0 %v2654_v46  ;;  %v2680_v42 = vpack.c.bf16 %v1388_v40, %v1387_v39  ;;  %v1405_v46 = vld [vmem:[%s3586_s9 + $0xf0] sm:$0xff] }
 0x434   :  { %v2682_v50 = vpack.c.bf16 %v1406_v48, %v1405_v46  ;;  %v1681_v46 = vld [vmem:[%s3590_s13 + $0x10] sm:$0xff]  ;;  %v1682_v48 = vld [vmem:[%s3590_s13 + $0x18] sm:$0xff] }
 0x435   :  { %2202 = vmatmul.mubr.f32.vlgmr.msra.gmra.mrb[20].mxu0 %v1147_v41  ;;  %v1419_v41 = vld [vmem:[%s3586_s9 + $0x160] sm:$0xff] }
 0x436   :  { %2657 = vmatpush3.bf16.msra.mxu0 %v2656_v2  ;;  %v2710_v45 = vpack.c.bf16 %v1420_v43, %v1419_v41  ;;  %v1390_v2 = vld [vmem:[%s3586_s9 + $0x78] sm:$0xff] }
 0x437   :  { %2659 = vmatprep.subr.bf16.mxu0 %v2658_v5  ;;  %v2684_v3 = vpack.c.bf16 %v1390_v2, %v1389_v19  ;;  %v1582_v5 = vld [vmem:[%s3588_s11] sm:$0xff]  ;;  %v2738_v2 = vpack.c.bf16 %v1682_v48, %v1681_v46 }
 0x438   :  { %2711 = vmatprep.subr.bf16.mxu1 %v2710_v45  ;;  %v2718_v31 = vpack.c.bf16 %v1583_v38, %v1582_v5  ;;  %v1686_v5 = vld [vmem:[%s3590_s13 + $0x38] sm:$0xff] }
 0x439   :  { %2713 = vmatpush3.bf16.msra.mxu1 %v2710_v45 }
 0x43a   :  { %2661 = vmatpush3.bf16.msra.mxu0 %v2660_v54  ;;  %2715 = vmatprep.subr.bf16.mxu1 %v2714_v23 }
 0x43b   :  { %2663 = vmatprep.subr.bf16.mxu0 %v2662_v59  ;;  %v1902_v59 = vld [vmem:[%s3585_s8] ss:$0 sm:$0xff] }
 0x43d   :  { %2717 = vmatpush3.bf16.msra.mxu1 %v2714_v23  ;;  %v1685_v23 = vld [vmem:[%s3590_s13 + $0x30] sm:$0xff] }
 0x43e   :  { %2665 = vmatpush3.bf16.msra.mxu0 %v2664_v35  ;;  %v2746_v38 = vpack.c.bf16 %v1686_v5, %v1685_v23 }
 0x43f   :  { %2667 = vmatprep.subr.bf16.mxu0 %v2666_v9 }
 0x442   :  { %2669 = vmatpush3.bf16.msra.mxu0 %v2668_v15 }
 0x443   :  { %2671 = vmatprep.subr.bf16.mxu0 %v2670_v52 }
 0x446   :  { %2673 = vmatpush3.bf16.msra.mxu0 %v2672_v25  ;;  %v2730_v25 = vpack.c.bf16 %v1589_v24, %v1588_v20 }
 0x447   :  { %2675 = vmatprep.subr.bf16.mxu0 %v2674_v32  ;;  %v1679_v32 = vld [vmem:[%s3590_s13] sm:$0xff] }
 0x448   :  { %v2734_v27 = vpack.c.bf16 %v1680_v26, %v1679_v32 }
 0x44a   :  { %2677 = vmatpush3.bf16.msra.mxu0 %v2676_v28 }
 0x44b   :  { %2679 = vmatprep.subr.bf16.mxu0 %v2678_v36 }
 0x44e   :  { %2681 = vmatpush3.bf16.msra.mxu0 %v2680_v42 }
 0x44f   :  { %2683 = vmatprep.subr.bf16.mxu0 %v2682_v50 }
 0x452   :  { %2685 = vmatpush3.bf16.msra.mxu0 %v2684_v3  ;;  %v1684_v3 = vld [vmem:[%s3590_s13 + $0x28] sm:$0xff] }
 0x453   :  { %2719 = vmatprep.subr.bf16.mxu0 %v2718_v31  ;;  %v2742_v4 = vpack.c.bf16 %v1684_v3, %v1683_v22 }
 0x4e8   :  { %v2059_v53 = vpop.f32.mrb[16].mxu0 }
 0x4e9   :  { %v2060_v54 = vpop.f32.mrb[17].mxu0 }
 0x4ea   :  { %v2061_v55 = vadd.f32 %v2060_v54, %v2059_v53  ;;  %v1778_v53 = vld [vmem:[%s3592_s15 + $0x8] sm:$0xff]  ;;  %v1779_v54 = vld [vmem:[%s3592_s15 + $0x10] sm:$0xff] }
 0x4ec   :  { %v2062_v56 = vpop.f32.mrb[18].mxu0  ;;  %v1270_v62 = vadd.f32 %v2061_v55, %v1902_v59 }
 0x4ed   :  { %v2063_v57 = vpop.f32.mrb[19].mxu0 }
 0x4ee   :  { %v2064_v58 = vadd.f32 %v2063_v57, %v2062_v56  ;;  %v1780_v56 = vld [vmem:[%s3592_s15 + $0x18] sm:$0xff] }
 0x4ef   :  { %v2754_v57 = vpack.c.bf16 %v1780_v56, %v1779_v54 }
 0x4f0   :  { %v1275_v60 = vadd.f32 %v2064_v58, %v1902_v59  ;;  %v1781_v58 = vld [vmem:[%s3592_s15 + $0x20] sm:$0xff]  ;;  %v1782_v59 = vld [vmem:[%s3592_s15 + $0x28] sm:$0xff] }
 0x508   :  { %v2203_v61 = vpop.f32.mrb[20].mxu0 }
 0x509   :  { %v1350_v63 = vadd.f32 %v2203_v61, %v1275_v60  ;;  %v1344_v37 = vpop.f32.mrb[21].mxu0  ;;  %v2758_v60 = vpack.c.bf16 %v1782_v59, %v1781_v58  ;;  %v1904_v61 = vld [vmem:[%s3589_s12] ss:$0 sm:$0xff] }
 0x50a   :  { %v1345_v0 = vadd.f32 %v1344_v37, %v1270_v62 }
 0x50b   :  { %v1354_v6 = vmax.f32 %v1350_v63, 0.0 }
 0x50c   :  { %v1353_v7 = vmax.f32 %v1345_v0, 0.0 }
 0x50d   :  { %v1356_v35 = vrot.slane %v1354_v6, 7  ;;  %v1367_v9 = vrot.slane %v1354_v6, 1 }
 0x50e   :  { %v1359_v10 = vrot.slane %v1353_v7, 7  ;;  %v1366_v12 = vrot.slane %v1353_v7, 1  ;;  %1494 = vmatprep.mubr.f32.mxu0 %v1353_v7  ;;  %v1784_v7 = vld [vmem:[%s3592_s15 + $0x38] sm:$0xff] }
 0x510   :  { %v1372_v1 = vsel %vm138_vm2, %v1367_v9, %v1366_v12  ;;  %v1363_v11 = vsel %vm130_vm3, %v1356_v35, %v1359_v10  ;;  %v1368_v13 = vsel %vm138_vm2, %v1366_v12, %v1367_v9  ;;  %v1360_v14 = vsel %vm130_vm3, %v1359_v10, %v1356_v35  ;;  %v1907_v9 = vld [vmem:[%s3591_s14] ss:$0 sm:$0xff] }
 0x511   :  { %v1374_v44 = vmul.f32 %v3027_v21, %v1372_v1  ;;  %v1364_v15 = vmul.f32 %v3049_v47, %v1363_v11  ;;  %v1373_v52 = vmul.f32 %v3004_v8, %v1368_v13  ;;  %v1365_v16 = vmul.f32 %v3052_v49, %v1360_v14  ;;  %v1585_v21 = vld [vmem:[%s3588_s11 + $0x18] sm:$0xff]  ;;  %v1586_v8 = vld [vmem:[%s3588_s11 + $0x20] sm:$0xff]  ;;  %v1587_v47 = vld [vmem:[%s3588_s11 + $0x28] sm:$0xff] }
 0x512   :  { %v2722_v18 = vpack.c.bf16 %v1585_v21, %v1584_v17  ;;  %v2726_v49 = vpack.c.bf16 %v1587_v47, %v1586_v8 }
 0x513   :  { %1495 = vmatmul.mubr.f32.vlgmr.msra.gmra.mrb[22].mxu0 %v1364_v15  ;;  %2236 = vmatprep.mubr.f32.mxu1 %v1373_v52 }
 0x514   :  { %1499 = vmatprep.mubr.f32.mxu0 %v1354_v6  ;;  %2237 = vmatmul.mubr.f32.vlgmr.msra.gmra.mrb[4].mxu1 %v1374_v44  ;;  %v1783_v6 = vld [vmem:[%s3592_s15 + $0x30] sm:$0xff]  ;;  %v1910_v44 = vld [vmem:[%s3593_s16] ss:$0 sm:$0xff] }
 0x515   :  { %2721 = vmatpush3.bf16.msra.mxu0 %v2718_v31  ;;  %v1777_v31 = vld [vmem:[%s3592_s15] sm:$0xff]  ;;  %v2762_v35 = vpack.c.bf16 %v1784_v7, %v1783_v6  ;;  %s2869_s15 = smov [#allocation7]  }
 0x516   :  { %2723 = vmatprep.subr.bf16.mxu0 %v2722_v18  ;;  %v2750_v55 = vpack.c.bf16 %v1778_v53, %v1777_v31  ;;  %s1880_s6 = sshll.u32 %s2869_s15, 4  ;;  %s1881_s6 = int_to_ptr.vmem [resolvable:$true] %s1880_s6 }
 0x517   :  { %1500 = vmatmul.mubr.f32.gmra.mrb[24].mxu0 %v1365_v16  ;;  %s2832_s14 = scalar_lea.vmem %s1881_s6, 256  ;;  %p2837_p3 = scmp.lt.s32.totalorder %s1881_s6, %s1881_s6 }
 0x518   :  { %2751 = vmatprep.subr.bf16.mxu1 %v2750_v55  ;;  %p2833_p2 = scmp.ne.s32.totalorder %s1881_s6, %s2832_s14  ;;  %p2838_p4 = scmp.lt.s32.totalorder %s2832_s14, %s2832_s14 }
 0x519   :  { %2725 = vmatpush3.bf16.msra.mxu0 %v2722_v18  ;;  %2753 = vmatpush3.bf16.msra.mxu1 %v2750_v55 }
 0x51a   :  { %2727 = vmatprep.subr.bf16.mxu0 %v2726_v49  ;;  %2755 = vmatprep.subr.bf16.mxu1 %v2754_v57  ;;  %p2839_p5 = por %p2838_p4, %p2837_p3 }
 0x51c   :  { %p2840_p6 = pnand %p2839_p5, %p2833_p2 }
 0x51d   :  { %2729 = vmatpush3.bf16.msra.mxu0 %v2726_v49  ;;  %2757 = vmatpush3.bf16.msra.mxu1 %v2754_v57 }
 0x51e   :  { %2731 = vmatprep.subr.bf16.mxu0 %v2730_v25  ;;  %2759 = vmatprep.subr.bf16.mxu1 %v2758_v60 }
 0x521   :  { %2733 = vmatpush3.bf16.msra.mxu0 %v2730_v25  ;;  %2761 = vmatpush3.bf16.msra.mxu1 %v2758_v60 }
 0x522   :  { %2735 = vmatprep.subr.bf16.mxu0 %v2734_v27  ;;  %2763 = vmatprep.subr.bf16.mxu1 %v2762_v35 }
 0x525   :  { %2765 = vmatpush3.bf16.msra.mxu1 %v2762_v35 }
 0x5e6   :  { %v2115_v51 = vpop.f32.mrb[22].mxu0 }
 0x5e7   :  { %v2116_v28 = vpop.f32.mrb[23].mxu0  ;;  %v2238_v29 = vpop.f32.mrb[4].mxu1 }
 0x5e8   :  { %v2117_v33 = vadd.f32 %v2116_v28, %v2115_v51  ;;  %v1571_v34 = vpop.f32.mrb[5].mxu1 }
 0x5ea   :  { %v1497_v36 = vadd.f32 %v2117_v33, %v1903_v30  ;;  %v2118_v39 = vpop.f32.mrb[24].mxu0 }
 0x5eb   :  { %v2119_v40 = vpop.f32.mrb[25].mxu0 }
 0x5ec   :  { %v1572_v41 = vadd.f32 %v1571_v34, %v1497_v36  ;;  %v2120_v42 = vadd.f32 %v2119_v40, %v2118_v39 }
 0x5ee   :  { %v1580_v43 = vmax.f32 %v1572_v41, 0.0  ;;  %v1502_v45 = vadd.f32 %v2120_v42, %v1903_v30 }
 0x5f0   :  { %v1577_v50 = vadd.f32 %v2238_v29, %v1502_v45  ;;  %2255 = vmatprep.mubr.msk.f32.mxu0 %vm1597_vm12, %v1580_v43 }
 0x5f2   :  { %v1581_v19 = vmax.f32 %v1577_v50, 0.0 }
 0x5f4   :  { %2256 = vmatmul.mubr.msk.f32.vlgmr.msra.gmra.mrb[26].mxu0 %vm1597_vm12, %v1581_v19 }
 0x5f5   :  { %2737 = vmatpush3.bf16.msra.mxu0 %v2734_v27 }
 0x5f6   :  { %2739 = vmatprep.subr.bf16.mxu0 %v2738_v2 }
 0x5f9   :  { %2741 = vmatpush3.bf16.msra.mxu0 %v2738_v2 }
 0x5fa   :  { %2743 = vmatprep.subr.bf16.mxu0 %v2742_v4 }
 0x5fd   :  { %2745 = vmatpush3.bf16.msra.mxu0 %v2742_v4 }
 0x5fe   :  { %2747 = vmatprep.subr.bf16.mxu0 %v2746_v38 }
 0x601   :  { %2749 = vmatpush3.bf16.msra.mxu0 %v2746_v38 }
 0x6c7   :  { %v2257_v62 = vpop.f32.mrb[26].mxu0 }
 0x6c8   :  { %v1670_v63 = vpop.f32.mrb[27].mxu0  ;;  %v1676_v0 = vadd.f32 %v2257_v62, %v1904_v61 }
 0x6c9   :  { %v1671_v37 = vadd.f32 %v1904_v61, %v1670_v63 }
 0x6cb   :  { %2274 = vmatprep.mubr.msk.f32.mxu0 %vm1597_vm12, %v1671_v37 }
 0x6cc   :  { %2275 = vmatmul.mubr.msk.f32.vlgmr.msra.gmra.mrb[28].mxu0 %vm1597_vm12, %v1676_v0 }
 0x79f   :  { %v2276_v10 = vpop.f32.mrb[28].mxu0 }
 0x7a0   :  { %v1772_v12 = vadd.f32 %v2276_v10, %v1907_v9  ;;  %v1766_v1 = vpop.f32.mrb[29].mxu0 }
 0x7a1   :  { %v1767_v11 = vadd.f32 %v1907_v9, %v1766_v1 }
 0x7a2   :  { %v1776_v14 = vmax.f32 %v1772_v12, 0.0 }
 0x7a3   :  { %v1775_v13 = vmax.f32 %v1767_v11, 0.0 }
 0x7a5   :  { %2293 = vmatprep.mubr.msk.f32.mxu1 %vm1597_vm12, %v1775_v13 }
 0x7a6   :  { %2294 = vmatmul.mubr.msk.f32.vlgmr.msra.gmra.mrb[6].mxu1 %vm1597_vm12, %v1776_v14 }
 0x879   :  { %v2295_v15 = vpop.f32.mrb[6].mxu1 }
 0x87a   :  { %v1870_v52 = vadd.f32 %v2295_v15, %v1910_v44  ;;  %v1864_v16 = vpop.f32.mrb[7].mxu1 }
 0x87b   :  { %v1865_v17 = vadd.f32 %v1910_v44, %v1864_v16 }
 0x87c   :  { %1874 = vst [vmem:[#allocation7 + $0x8] sm:$0xff] %v1870_v52 }
 0x87d   :  { %1873 = vst [vmem:[#allocation7] sm:$0xff] %v1865_v17 }
 0x87e   :  { %2843 = shalt.err (!%p2840_p6)
}
 0x87f   :  { %s2844_s16 = scalar_lea.hbm %s3594_s17, 256 }
 0x880   :  { %p2845_p7 = scmp.ne.s32.totalorder %s3594_s17, %s2844_s16  ;;  %p2848_p8 = scmp.lt.u32.totalorder %s2844_s16, %s3594_s17 }
 0x882   :  { %p2850_p9 = pnand %p2848_p8, %p2845_p7 }
 0x884   :  { %2853 = shalt.err (!%p2850_p9)
}
 0x885   :  { %1886 = dma.vmem_to_hbm [thread:$0]  %s1881_s6, 256, %s3594_s17, [#allocation4], %s2864_s3, %s2864_s3, %s2865_s25  }
 0x886   :  { %2858 = dma.done.wait [#allocation4], 256  }
 0x887   :  { %2859 = vsyncadd [#allocation4], 4294967040 }
 0x888   :  { %1890 = vsyncpa [#allocation3], 1 }
 0x889   :  { %1891 = vsyncpa [#allocation6], 1 }
 0x88a   :  { %1892 = vsyncpa [#allocation4], 1 }

</bundles_post_ra>
